<compile_context>
chip_gen: v7x
topology: tpu7x:2x2x1
jax: 0.10.0
libtpu: 0.0.40
codegen_flags: <defaults>
</compile_context>

<pallas_src>
import functools

import jax
import jax.numpy as jnp
import numpy as np
from jax.experimental import pallas as pl
from jax.experimental.pallas import tpu as pltpu

LANE = 128
SUBLANE = 8


def _round_up(x, m):
    return ((x + m - 1) // m) * m


def _pick_row_tile(n, max_tile=512):
    for t in (512, 256, 128, 64, 32, 16, 8):
        if t <= max_tile and n % t == 0:
            return t
    return n


def _pick_col_tile(g, max_tile=2048):
    # g is a multiple of LANE
    if g <= max_tile:
        return g
    for t in range(max_tile, LANE - 1, -LANE):
        if g % t == 0:
            return t
    return LANE


def _pick_batch_tile(bp):
    for bt in (32, 24, 16, 8):
        if bp % bt == 0:
            return bt
    return bp


def _pick_time_chunk(t_total, bytes_per_t, budget=4 * 1024 * 1024):
    best = 1
    for tc in range(1, t_total + 1):
        if t_total % tc == 0 and tc * bytes_per_t <= budget:
            best = tc
    return best


# ----------------------------------------------------------------------------
# Kernel 1: hoisted input projection  xg = x @ W_ih + b   (bf16 output slab)
# ----------------------------------------------------------------------------
def _proj_kernel(x_ref, w_ref, b_ref, o_ref):
    # Layer-0 has tiny K (=input_shape); the MXU K underfill is accepted since
    # this matmul is entirely off the serial recurrence path.
    acc = jnp.dot(x_ref[...].astype(jnp.bfloat16), w_ref[...],
                  preferred_element_type=jnp.float32) + b_ref[...]
    o_ref[...] = acc.astype(o_ref.dtype)


def input_projection(x_flat, w_bf16, b_f32):
    """x_flat: (N, D); w_bf16: (D, G) bf16; b_f32: (1, G) f32 -> (N, G) bf16."""
    N, D = x_flat.shape
    G = w_bf16.shape[-1]
    tn = _pick_row_tile(N)
    tg = _pick_col_tile(G)
    return pl.pallas_call(
        _proj_kernel,
        out_shape=jax.ShapeDtypeStruct((N, G), jnp.bfloat16),
        grid=(N // tn, G // tg),
        in_specs=[
            pl.BlockSpec((tn, D), lambda i, j: (i, 0)),
            pl.BlockSpec((D, tg), lambda i, j: (0, j)),
            pl.BlockSpec((1, tg), lambda i, j: (0, j)),
        ],
        out_specs=pl.BlockSpec((tn, tg), lambda i, j: (i, j)),
        compiler_params=pltpu.CompilerParams(
            dimension_semantics=("parallel", "parallel")),
    )(x_flat, w_bf16, b_f32)


# ----------------------------------------------------------------------------
# Kernel 2: time-chunked recurrence (+ optional fused, loop-hoisted head)
# ----------------------------------------------------------------------------
def _make_lstm_recurrent_kernel(Tc, Bt, Hs, G, with_head, O=None):
    packed = (Hs % LANE) != 0     # small-H layout: gates packed, offsets k*Hs

    def gate_activations(gates):
        if packed:
            # Full-tile activations: one sigmoid pass + one tanh pass over the
            # whole (Bt, G) tile, blended with a lane mask (g gate uses tanh).
            sig = jax.nn.sigmoid(gates)
            tnh = jnp.tanh(gates)
            lane = jax.lax.broadcasted_iota(jnp.int32, gates.shape, 1)
            act = jnp.where((lane >= 2 * Hs) & (lane < 3 * Hs), tnh, sig)
            i_g = act[:, 0 * Hs:1 * Hs]
            f_g = act[:, 1 * Hs:2 * Hs]
            g_g = act[:, 2 * Hs:3 * Hs]
            o_g = act[:, 3 * Hs:4 * Hs]
        else:
            # Per-gate lane-aligned slices (Hs is a multiple of 128).
            i_g = jax.nn.sigmoid(gates[:, 0 * Hs:1 * Hs])
            f_g = jax.nn.sigmoid(gates[:, 1 * Hs:2 * Hs])
            g_g = jnp.tanh(gates[:, 2 * Hs:3 * Hs])
            o_g = jax.nn.sigmoid(gates[:, 3 * Hs:4 * Hs])
        return i_g, f_g, g_g, o_g

    unroll = Tc if Tc <= 8 else 8

    def kernel(xg_ref, w_hh_ref, h0_ref, c0_ref, *rest):
        if with_head:
            (w_lin_ref, b_lin_ref,
             pred_ref, hN_ref, cN_ref,
             h_sc, c_sc, hseq_sc) = rest
        else:
            out_ref, hN_ref, cN_ref, h_sc, c_sc = rest

        t_idx = pl.program_id(1)

        @pl.when(t_idx == 0)
        def _():
            h_sc[...] = h0_ref[...]
            c_sc[...] = c0_ref[...]

        # Loop-invariant load hoisted out of the time loop.
        w_hh = w_hh_ref[...]

        def step(t, carry):
            h, c = carry
            # Only h @ W_hh remains on the serial path; xg already holds x@W_ih+b.
            gates = xg_ref[t].astype(jnp.float32) + jnp.dot(
                h.astype(jnp.bfloat16), w_hh,
                preferred_element_type=jnp.float32)
            i_g, f_g, g_g, o_g = gate_activations(gates)
            c_new = f_g * c + i_g * g_g
            h_new = o_g * jnp.tanh(c_new)
            if with_head:
                hseq_sc[t] = h_new
            else:
                out_ref[t] = h_new.astype(out_ref.dtype)
            return h_new, c_new

        h_fin, c_fin = jax.lax.fori_loop(
            0, Tc, step, (h_sc[...], c_sc[...]), unroll=unroll)
        h_sc[...] = h_fin
        c_sc[...] = c_fin

        if with_head:
            # Head hoisted out of the time loop: one batched matmul per chunk.
            # dropout1/dropout2 are identity (eval mode).
            a = jnp.tanh(hseq_sc[...]).reshape(Tc * Bt, Hs)
            y = jnp.dot(a.astype(jnp.bfloat16), w_lin_ref[...],
                        preferred_element_type=jnp.float32) + b_lin_ref[...]
            pred_ref[...] = jnp.tanh(y).reshape(Tc, Bt, O).astype(pred_ref.dtype)

        @pl.when(t_idx == pl.num_programs(1) - 1)
        def _():
            hN_ref[...] = h_fin.astype(hN_ref.dtype)
            cN_ref[...] = c_fin.astype(cN_ref.dtype)

    return kernel


def lstm_recurrent(xg, w_hh, h0, c0, head=None):
    """xg: (T, Bp, G) bf16; w_hh: (Hs, G) bf16; h0/c0: (Bp, Hs) f32.
    head=None         -> (out_seq (T,Bp,Hs) bf16, hN, cN)
    head=(w_lin,b_lin)-> (pred (T,Bp,O) f32,      hN, cN)."""
    T, Bp, G = xg.shape
    Hs = h0.shape[-1]
    with_head = head is not None

    Bt = _pick_batch_tile(Bp)
    if with_head:
        O = head[0].shape[-1]
        out_width, out_bytes = O, 4
        extra_per_t = Bt * Hs * 4                      # hseq scratch
    else:
        O = None
        out_width, out_bytes = Hs, 2
        extra_per_t = 0
    bytes_per_t = Bt * G * 2 + Bt * out_width * out_bytes + extra_per_t
    Tc = _pick_time_chunk(T, bytes_per_t)
    n_bt, n_tc = Bp // Bt, T // Tc

    kernel = _make_lstm_recurrent_kernel(Tc, Bt, Hs, G, with_head, O=O)

    in_specs = [
        pl.BlockSpec((Tc, Bt, G), lambda bi, ti: (ti, bi, 0)),
        pl.BlockSpec((Hs, G), lambda bi, ti: (0, 0)),
        pl.BlockSpec((Bt, Hs), lambda bi, ti: (bi, 0)),
        pl.BlockSpec((Bt, Hs), lambda bi, ti: (bi, 0)),
    ]
    state_spec = pl.BlockSpec((Bt, Hs), lambda bi, ti: (bi, 0))
    state_shape = jax.ShapeDtypeStruct((Bp, Hs), jnp.float32)
    scratch = [pltpu.VMEM((Bt, Hs), jnp.float32),      # h carry
               pltpu.VMEM((Bt, Hs), jnp.float32)]      # c carry

    if with_head:
        w_lin, b_lin = head
        in_specs += [pl.BlockSpec((Hs, O), lambda bi, ti: (0, 0)),
                     pl.BlockSpec((1, O), lambda bi, ti: (0, 0))]
        out_shape = (jax.ShapeDtypeStruct((T, Bp, O), jnp.float32),
                     state_shape, state_shape)
        out_specs = [pl.BlockSpec((Tc, Bt, O), lambda bi, ti: (ti, bi, 0)),
                     state_spec, state_spec]
        scratch += [pltpu.VMEM((Tc, Bt, Hs), jnp.float32)]
        args = (xg, w_hh, h0, c0, w_lin, b_lin)
        head_bytes = Hs * O * 2 + O * 4 + Tc * Bt * Hs * 4
    else:
        out_shape = (jax.ShapeDtypeStruct((T, Bp, Hs), jnp.bfloat16),
                     state_shape, state_shape)
        out_specs = [pl.BlockSpec((Tc, Bt, Hs), lambda bi, ti: (ti, bi, 0)),
                     state_spec, state_spec]
        args = (xg, w_hh, h0, c0)
        head_bytes = 0

    # Explicit VMEM budget (double-buffered pipeline blocks + resident weights);
    # only raise the scoped limit when the default (~32 MiB) would not fit.
    need = (2 * (Tc * Bt * G * 2 + Tc * Bt * out_width * out_bytes)
            + Hs * G * 2 + 8 * Bt * Hs * 4 + head_bytes)
    vmem_limit = None if 2 * need <= 32 * 1024 * 1024 else int(
        min(2 * need, 64 * 1024 * 1024))

    return pl.pallas_call(
        kernel,
        out_shape=out_shape,
        grid=(n_bt, n_tc),
        in_specs=in_specs,
        out_specs=out_specs,
        scratch_shapes=scratch,
        compiler_params=pltpu.CompilerParams(
            dimension_semantics=("parallel", "arbitrary"),
            vmem_limit_bytes=vmem_limit),
    )(*args)


# ----------------------------------------------------------------------------
# Full forward pass
# ----------------------------------------------------------------------------
def lstm_model_forward(params, x, h_n, c_n):
    """
    x:   (B, T, D)  batch_first, like the PyTorch module
    h_n: (L, B, H);  c_n: (L, B, H)
    returns (activ2 (B*T, O), h_n (L,B,H), c_n (L,B,H)).
    """
    B, T, D = x.shape
    L, _, H = h_n.shape
    Hs, G, O = params["Hs"], params["G"], params["O"]
    Bp = _round_up(B, SUBLANE)

    # Time-major, batch padded to a sublane multiple (zero padding is exact for
    # the recurrence; padded rows are sliced off before returning).
    x_tbd = jnp.transpose(x, (1, 0, 2)).astype(jnp.bfloat16)
    x_p = jnp.zeros((T, Bp, D), jnp.bfloat16).at[:, :B, :].set(x_tbd)
    h0_p = jnp.zeros((L, Bp, Hs), jnp.float32).at[:, :B, :H].set(
        h_n.astype(jnp.float32))
    c0_p = jnp.zeros((L, Bp, Hs), jnp.float32).at[:, :B, :H].set(
        c_n.astype(jnp.float32))

    layer_in = x_p.reshape(T * Bp, D)                       # time-major rows
    h_finals, c_finals = [], []
    pred_tbo = None
    for layer in range(L):
        w_ih, w_hh, b = params["lstm"][layer]
        xg = input_projection(layer_in, w_ih, b)            # (T*Bp, G) bf16
        xg = xg.reshape(T, Bp, G)                           # free reshape
        head = (params["lin_w_t"], params["lin_b"]) if layer == L - 1 else None
        if head is not None:
            pred_tbo, h_f, c_f = lstm_recurrent(xg, w_hh, h0_p[layer],
                                                c0_p[layer], head=head)
        else:
            out_seq, h_f, c_f = lstm_recurrent(xg, w_hh, h0_p[layer],
                                               c0_p[layer], head=None)
            layer_in = out_seq.reshape(T * Bp, Hs)          # bf16 inter-layer
        h_finals.append(h_f[:B, :H])
        c_finals.append(c_f[:B, :H])

    h_out = jnp.stack(h_finals, axis=0)                     # (L, B, H)
    c_out = jnp.stack(c_finals, axis=0)

    # output.view(-1, hidden) with batch_first => rows ordered (b, t).
    pred = jnp.transpose(pred_tbo, (1, 0, 2))[:B].reshape(B * T, O)
    return pred, h_out, c_out


# ----------------------------------------------------------------------------
# Parameters: PyTorch-style raw params, then packed/padded bf16 kernel params
# ----------------------------------------------------------------------------
def init_raw_params(key, input_shape, hidden_shape, num_layers, output_shape):
    raw = {"lstm": []}
    bound = 1.0 / float(hidden_shape) ** 0.5
    for layer in range(num_layers):
        in_dim = input_shape if layer == 0 else hidden_shape
        key, k1, k2, k3, k4 = jax.random.split(key, 5)
        w_ih = jax.random.uniform(k1, (4 * hidden_shape, in_dim),
                                  minval=-bound, maxval=bound, dtype=jnp.float32)
        w_hh = jax.random.uniform(k2, (4 * hidden_shape, hidden_shape),
                                  minval=-bound, maxval=bound, dtype=jnp.float32)
        b_ih = jax.random.uniform(k3, (4 * hidden_shape,),
                                  minval=-bound, maxval=bound, dtype=jnp.float32)
        b_hh = jax.random.uniform(k4, (4 * hidden_shape,),
                                  minval=-bound, maxval=bound, dtype=jnp.float32)
        raw["lstm"].append((w_ih, w_hh, b_ih, b_hh))
    key, k1, k2 = jax.random.split(key, 3)
    raw["lin_w"] = jax.random.uniform(k1, (output_shape, hidden_shape),
                                      minval=-bound, maxval=bound, dtype=jnp.float32)
    raw["lin_b"] = jax.random.uniform(k2, (output_shape,),
                                      minval=-bound, maxval=bound, dtype=jnp.float32)
    return raw


def prepare_params(raw, input_shape, hidden_shape, num_layers, output_shape):
    """Pack/pad weights for the kernels, transpose to (in, G), fuse the two
    biases, cast matmul weights to bf16.  Zero padding is exact for LSTM."""
    H, L, O = hidden_shape, num_layers, output_shape
    per_gate = H >= LANE
    if per_gate:
        Hs = _round_up(H, LANE)        # per-gate lane padding
        G = 4 * Hs
    else:
        Hs = H                         # packed small-H layout (no per-gate pad)
        G = _round_up(4 * H, LANE)

    params = {"lstm": [], "H": H, "O": O, "Hs": Hs, "G": G}
    for layer in range(L):
        w_ih, w_hh, b_ih, b_hh = raw["lstm"][layer]
        in_dim = w_ih.shape[1]
        in_p = in_dim if layer == 0 else Hs
        if per_gate:
            w_ih_g = w_ih.reshape(4, H, in_dim)
            w_ih_p = jnp.zeros((4, Hs, in_p), jnp.float32).at[:, :H, :in_dim].set(w_ih_g)
            w_ih_t = jnp.transpose(w_ih_p, (2, 0, 1)).reshape(in_p, G)
            w_hh_g = w_hh.reshape(4, H, H)
            w_hh_p = jnp.zeros((4, Hs, Hs), jnp.float32).at[:, :H, :H].set(w_hh_g)
            w_hh_t = jnp.transpose(w_hh_p, (2, 0, 1)).reshape(Hs, G)
            b_p = jnp.zeros((4, Hs), jnp.float32).at[:, :H].set(
                (b_ih + b_hh).reshape(4, H)).reshape(1, G)
        else:
            w_ih_t = jnp.zeros((in_p, G), jnp.float32).at[:in_dim, :4 * H].set(w_ih.T)
            w_hh_t = jnp.zeros((Hs, G), jnp.float32).at[:, :4 * H].set(w_hh.T)
            b_p = jnp.zeros((1, G), jnp.float32).at[0, :4 * H].set(b_ih + b_hh)
        params["lstm"].append((w_ih_t.astype(jnp.bfloat16),
                               w_hh_t.astype(jnp.bfloat16), b_p))
    w_lin_t = jnp.zeros((Hs, O), jnp.float32).at[:H, :].set(raw["lin_w"].T)
    params["lin_w_t"] = w_lin_t.astype(jnp.bfloat16)
    params["lin_b"] = raw["lin_b"].reshape(1, O).astype(jnp.float32)
    return params


# ----------------------------------------------------------------------------
# Pure-JAX reference (bf16-rounded weights, f32 math) for a sanity check
# ----------------------------------------------------------------------------
def reference_forward(raw, x, h0, c0):
    B, T, _ = x.shape
    L, _, H = h0.shape

    def bf(w):
        return w.astype(jnp.bfloat16).astype(jnp.float32)

    layer_in = x
    h_fin, c_fin = [], []
    for l in range(L):
        w_ih, w_hh, b_ih, b_hh = raw["lstm"][l]
        w_ih, w_hh = bf(w_ih), bf(w_hh)
        h, c = h0[l], c0[l]
        outs = []
        for t in range(T):
            g = layer_in[:, t, :] @ w_ih.T + h @ w_hh.T + b_ih + b_hh
            i = jax.nn.sigmoid(g[:, :H])
            f = jax.nn.sigmoid(g[:, H:2 * H])
            gg = jnp.tanh(g[:, 2 * H:3 * H])
            o = jax.nn.sigmoid(g[:, 3 * H:])
            c = f * c + i * gg
            h = o * jnp.tanh(c)
            outs.append(h)
        layer_in = jnp.stack(outs, axis=1)
        h_fin.append(h)
        c_fin.append(c)
    flat = layer_in.reshape(-1, H)
    pred = jnp.tanh(jnp.tanh(flat) @ bf(raw["lin_w"]).T + raw["lin_b"])
    return pred, jnp.stack(h_fin), jnp.stack(c_fin)


# ----------------------------------------------------------------------------
# Main
# ----------------------------------------------------------------------------
if __name__ == "__main__":
    input_shape = 4
    hidden_shape = 32
    num_layers = 2
    output_shape = 4
    batch = 2
    seq = 8

    key = jax.random.PRNGKey(0)
    key, kx, kh, kc, kp = jax.random.split(key, 5)

    x = jax.random.normal(kx, (batch, seq, input_shape), dtype=jnp.float32)
    h0 = jax.random.normal(kh, (num_layers, batch, hidden_shape), dtype=jnp.float32) * 0.1
    c0 = jax.random.normal(kc, (num_layers, batch, hidden_shape), dtype=jnp.float32) * 0.1

    raw = init_raw_params(kp, input_shape, hidden_shape, num_layers, output_shape)
    params = prepare_params(raw, input_shape, hidden_shape, num_layers, output_shape)

    fwd = jax.jit(functools.partial(lstm_model_forward, params))
    activ2, h_n, c_n = fwd(x, h0, c0)
    jax.block_until_ready((activ2, h_n, c_n))

    assert activ2.shape == (batch * seq, output_shape)
    assert h_n.shape == (num_layers, batch, hidden_shape)
    assert c_n.shape == (num_layers, batch, hidden_shape)

    pred_r, h_r, c_r = reference_forward(raw, x, h0, c0)
    assert np.allclose(np.asarray(activ2), np.asarray(pred_r), atol=5e-2), "pred mismatch"
    assert np.allclose(np.asarray(h_n), np.asarray(h_r), atol=5e-2), "h_n mismatch"
    assert np.allclose(np.asarray(c_n), np.asarray(c_r), atol=5e-2), "c_n mismatch"

    print("KERNEL_OK")
</pallas_src>

<mosaic_0001>
module attributes {stable_mosaic.version = 11 : i64} {
  func.func @_proj_kernel(%arg0: i32, %arg1: i32, %arg2: memref<64x4xbf16, #tpu.memory_space<vmem>>, %arg3: memref<4x128xbf16, #tpu.memory_space<vmem>>, %arg4: memref<1x128xf32, #tpu.memory_space<vmem>>, %arg5: memref<64x128xbf16, #tpu.memory_space<vmem>>) attributes {dimension_semantics = [#tpu.dimension_semantics<parallel>, #tpu.dimension_semantics<parallel>], iteration_bounds = array<i64: 1, 1>, scalar_prefetch = 0 : i64, scratch_operands = 0 : i64, tpu.core_type = #tpu.core_type<tc>, window_params = [{transform_indices = @transform_0, window_bounds = array<i64: 64, 4>}, {transform_indices = @transform_1, window_bounds = array<i64: 4, 128>}, {transform_indices = @transform_2, window_bounds = array<i64: 1, 128>}, {transform_indices = @transform_3, window_bounds = array<i64: 64, 128>}]} {
    %c0 = arith.constant 0 : index
    %c0_0 = arith.constant 0 : index
    %0 = vector.load %arg2[%c0, %c0_0] : memref<64x4xbf16, #tpu.memory_space<vmem>>, vector<64x4xbf16>
    %c0_1 = arith.constant 0 : index
    %c0_2 = arith.constant 0 : index
    %1 = vector.load %arg3[%c0_1, %c0_2] : memref<4x128xbf16, #tpu.memory_space<vmem>>, vector<4x128xbf16>
    %cst = arith.constant dense<0.000000e+00> : vector<64x128xf32>
    %2 = tpu.matmul %0, %1, %cst {dimension_numbers = #tpu.dot_dimension_numbers<[1], [0], [0], [1], [0, 0, 1, 1], [], []>} : vector<64x4xbf16>, vector<4x128xbf16>, vector<64x128xf32> -> vector<64x128xf32>
    %c0_3 = arith.constant 0 : index
    %c0_4 = arith.constant 0 : index
    %3 = vector.load %arg4[%c0_3, %c0_4] : memref<1x128xf32, #tpu.memory_space<vmem>>, vector<1x128xf32>
    %4 = vector.broadcast %3 : vector<1x128xf32> to vector<64x128xf32>
    %5 = arith.addf %2, %4 : vector<64x128xf32>
    %6 = arith.truncf %5 : vector<64x128xf32> to vector<64x128xbf16>
    %c0_5 = arith.constant 0 : index
    %c0_6 = arith.constant 0 : index
    %7 = vector.load %arg5[%c0_5, %c0_6] : memref<64x128xbf16, #tpu.memory_space<vmem>>, vector<64x128xbf16>
    tpu.vector_store %arg5[%c0_5, %c0_6], %6 {strides = array<i32>} : memref<64x128xbf16, #tpu.memory_space<vmem>>, vector<64x128xbf16>,
    return
  }
  func.func @transform_0(%arg0: i32, %arg1: i32) -> (i32, i32) {
    %c0_i32 = arith.constant 0 : i32
    %c0_i32_0 = arith.constant 0 : i32
    return %arg0, %c0_i32 : i32, i32
  }
  func.func @transform_1(%arg0: i32, %arg1: i32) -> (i32, i32) {
    %c0_i32 = arith.constant 0 : i32
    %c0_i32_0 = arith.constant 0 : i32
    return %c0_i32, %arg1 : i32, i32
  }
  func.func @transform_2(%arg0: i32, %arg1: i32) -> (i32, i32) {
    %c0_i32 = arith.constant 0 : i32
    %c0_i32_0 = arith.constant 0 : i32
    return %c0_i32, %arg1 : i32, i32
  }
  func.func @transform_3(%arg0: i32, %arg1: i32) -> (i32, i32) {
    %c0_i32 = arith.constant 0 : i32
    return %arg0, %arg1 : i32, i32
  }
}

module attributes {stable_mosaic.version = 11 : i64} {
  func.func @_proj_kernel(%arg0: i32, %arg1: i32, %arg2: memref<64x32xbf16, #tpu.memory_space<vmem>>, %arg3: memref<32x128xbf16, #tpu.memory_space<vmem>>, %arg4: memref<1x128xf32, #tpu.memory_space<vmem>>, %arg5: memref<64x128xbf16, #tpu.memory_space<vmem>>) attributes {dimension_semantics = [#tpu.dimension_semantics<parallel>, #tpu.dimension_semantics<parallel>], iteration_bounds = array<i64: 1, 1>, scalar_prefetch = 0 : i64, scratch_operands = 0 : i64, tpu.core_type = #tpu.core_type<tc>, window_params = [{transform_indices = @transform_0, window_bounds = array<i64: 64, 32>}, {transform_indices = @transform_1, window_bounds = array<i64: 32, 128>}, {transform_indices = @transform_2, window_bounds = array<i64: 1, 128>}, {transform_indices = @transform_3, window_bounds = array<i64: 64, 128>}]} {
    %c0 = arith.constant 0 : index
    %c0_0 = arith.constant 0 : index
    %0 = vector.load %arg2[%c0, %c0_0] : memref<64x32xbf16, #tpu.memory_space<vmem>>, vector<64x32xbf16>
    %c0_1 = arith.constant 0 : index
    %c0_2 = arith.constant 0 : index
    %1 = vector.load %arg3[%c0_1, %c0_2] : memref<32x128xbf16, #tpu.memory_space<vmem>>, vector<32x128xbf16>
    %cst = arith.constant dense<0.000000e+00> : vector<64x128xf32>
    %2 = tpu.matmul %0, %1, %cst {dimension_numbers = #tpu.dot_dimension_numbers<[1], [0], [0], [1], [0, 0, 1, 1], [], []>} : vector<64x32xbf16>, vector<32x128xbf16>, vector<64x128xf32> -> vector<64x128xf32>
    %c0_3 = arith.constant 0 : index
    %c0_4 = arith.constant 0 : index
    %3 = vector.load %arg4[%c0_3, %c0_4] : memref<1x128xf32, #tpu.memory_space<vmem>>, vector<1x128xf32>
    %4 = vector.broadcast %3 : vector<1x128xf32> to vector<64x128xf32>
    %5 = arith.addf %2, %4 : vector<64x128xf32>
    %6 = arith.truncf %5 : vector<64x128xf32> to vector<64x128xbf16>
    %c0_5 = arith.constant 0 : index
    %c0_6 = arith.constant 0 : index
    %7 = vector.load %arg5[%c0_5, %c0_6] : memref<64x128xbf16, #tpu.memory_space<vmem>>, vector<64x128xbf16>
    tpu.vector_store %arg5[%c0_5, %c0_6], %6 {strides = array<i32>} : memref<64x128xbf16, #tpu.memory_space<vmem>>, vector<64x128xbf16>,
    return
  }
  func.func @transform_0(%arg0: i32, %arg1: i32) -> (i32, i32) {
    %c0_i32 = arith.constant 0 : i32
    %c0_i32_0 = arith.constant 0 : i32
    return %arg0, %c0_i32 : i32, i32
  }
  func.func @transform_1(%arg0: i32, %arg1: i32) -> (i32, i32) {
    %c0_i32 = arith.constant 0 : i32
    %c0_i32_0 = arith.constant 0 : i32
    return %c0_i32, %arg1 : i32, i32
  }
  func.func @transform_2(%arg0: i32, %arg1: i32) -> (i32, i32) {
    %c0_i32 = arith.constant 0 : i32
    %c0_i32_0 = arith.constant 0 : i32
    return %c0_i32, %arg1 : i32, i32
  }
  func.func @transform_3(%arg0: i32, %arg1: i32) -> (i32, i32) {
    %c0_i32 = arith.constant 0 : i32
    return %arg0, %arg1 : i32, i32
  }
}

module attributes {stable_mosaic.version = 11 : i64} {
  func.func @kernel(%arg0: i32, %arg1: i32, %arg2: memref<8x8x128xbf16, #tpu.memory_space<vmem>>, %arg3: memref<32x128xbf16, #tpu.memory_space<vmem>>, %arg4: memref<8x32xf32, #tpu.memory_space<vmem>>, %arg5: memref<8x32xf32, #tpu.memory_space<vmem>>, %arg6: memref<8x8x32xbf16, #tpu.memory_space<vmem>>, %arg7: memref<8x32xf32, #tpu.memory_space<vmem>>, %arg8: memref<8x32xf32, #tpu.memory_space<vmem>>, %arg9: memref<8x32xf32, #tpu.memory_space<vmem>>, %arg10: memref<8x32xf32, #tpu.memory_space<vmem>>) attributes {dimension_semantics = [#tpu.dimension_semantics<parallel>, #tpu.dimension_semantics<arbitrary>], iteration_bounds = array<i64: 1, 1>, scalar_prefetch = 0 : i64, scratch_operands = 2 : i64, tpu.core_type = #tpu.core_type<tc>, window_params = [{transform_indices = @transform_0, window_bounds = array<i64: 8, 8, 128>}, {pipeline_mode = #tpu.pipeline_mode<synchronous>, transform_indices = @transform_1, window_bounds = array<i64: 32, 128>}, {transform_indices = @transform_2, window_bounds = array<i64: 8, 32>}, {transform_indices = @transform_3, window_bounds = array<i64: 8, 32>}, {transform_indices = @transform_4, window_bounds = array<i64: 8, 8, 32>}, {transform_indices = @transform_5, window_bounds = array<i64: 8, 32>}, {transform_indices = @transform_6, window_bounds = array<i64: 8, 32>}]} {
    %c0_i32 = arith.constant 0 : i32
    %0 = arith.cmpi eq, %arg1, %c0_i32 : i32
    %1 = arith.extui %0 : i1 to i32
    %c0_i32_0 = arith.constant 0 : i32
    %2 = arith.cmpi ne, %1, %c0_i32_0 : i32
    scf.if %2 {
      %c0_74 = arith.constant 0 : index
      %c0_75 = arith.constant 0 : index
      %283 = vector.load %arg4[%c0_74, %c0_75] : memref<8x32xf32, #tpu.memory_space<vmem>>, vector<8x32xf32>
      %c0_76 = arith.constant 0 : index
      %c0_77 = arith.constant 0 : index
      %284 = vector.load %arg9[%c0_76, %c0_77] : memref<8x32xf32, #tpu.memory_space<vmem>>, vector<8x32xf32>
      tpu.vector_store %arg9[%c0_76, %c0_77], %283 {strides = array<i32>} : memref<8x32xf32, #tpu.memory_space<vmem>>, vector<8x32xf32>,
      %c0_78 = arith.constant 0 : index
      %c0_79 = arith.constant 0 : index
      %285 = vector.load %arg5[%c0_78, %c0_79] : memref<8x32xf32, #tpu.memory_space<vmem>>, vector<8x32xf32>
      %c0_80 = arith.constant 0 : index
      %c0_81 = arith.constant 0 : index
      %286 = vector.load %arg10[%c0_80, %c0_81] : memref<8x32xf32, #tpu.memory_space<vmem>>, vector<8x32xf32>
      tpu.vector_store %arg10[%c0_80, %c0_81], %285 {strides = array<i32>} : memref<8x32xf32, #tpu.memory_space<vmem>>, vector<8x32xf32>,
    } else {
    }
    %c0 = arith.constant 0 : index
    %c0_1 = arith.constant 0 : index
    %3 = vector.load %arg3[%c0, %c0_1] : memref<32x128xbf16, #tpu.memory_space<vmem>>, vector<32x128xbf16>
    %c0_2 = arith.constant 0 : index
    %c0_3 = arith.constant 0 : index
    %4 = vector.load %arg9[%c0_2, %c0_3] : memref<8x32xf32, #tpu.memory_space<vmem>>, vector<8x32xf32>
    %c0_4 = arith.constant 0 : index
    %c0_5 = arith.constant 0 : index
    %5 = vector.load %arg10[%c0_4, %c0_5] : memref<8x32xf32, #tpu.memory_space<vmem>>, vector<8x32xf32>
    %c0_i32_6 = arith.constant 0 : i32
    %6 = arith.index_cast %c0_i32_6 : i32 to index
    %c0_7 = arith.constant 0 : index
    %c0_8 = arith.constant 0 : index
    %7 = vector.load %arg2[%6, %c0_7, %c0_8] : memref<8x8x128xbf16, #tpu.memory_space<vmem>>, vector<1x8x128xbf16>
    %8 = vector.shape_cast %7 : vector<1x8x128xbf16> to vector<8x128xbf16>
    %9 = arith.extf %8 : vector<8x128xbf16> to vector<8x128xf32>
    %10 = arith.truncf %4 : vector<8x32xf32> to vector<8x32xbf16>
    %cst = arith.constant dense<0.000000e+00> : vector<8x128xf32>
    %11 = tpu.matmul %10, %3, %cst {dimension_numbers = #tpu.dot_dimension_numbers<[1], [0], [0], [1], [0, 0, 1, 1], [], []>} : vector<8x32xbf16>, vector<32x128xbf16>, vector<8x128xf32> -> vector<8x128xf32>
    %12 = arith.addf %9, %11 : vector<8x128xf32>
    %13 = arith.negf %12 : vector<8x128xf32>
    %14 = math.exp %13 : vector<8x128xf32>
    %cst_9 = arith.constant 1.000000e+00 : f32
    %15 = vector.broadcast %cst_9 : f32 to vector<8x128xf32>
    %16 = arith.addf %15, %14 : vector<8x128xf32>
    %17 = arith.divf %15, %16 : vector<8x128xf32>
    %18 = math.tanh %12 : vector<8x128xf32>
    %19 = tpu.iota {dimensions = array<i32: 1>} : vector<8x128xi32>
    %c64_i32 = arith.constant 64 : i32
    %20 = vector.broadcast %c64_i32 : i32 to vector<8x128xi32>
    %21 = arith.cmpi sge, %19, %20 : vector<8x128xi32>
    %c96_i32 = arith.constant 96 : i32
    %22 = vector.broadcast %c96_i32 : i32 to vector<8x128xi32>
    %23 = arith.cmpi slt, %19, %22 : vector<8x128xi32>
    %24 = arith.andi %21, %23 : vector<8x128xi1>
    %25 = arith.select %24, %18, %17 : vector<8x128xi1>, vector<8x128xf32>
    %26 = vector.extract_strided_slice %25 {offsets = [0, 0], sizes = [8, 32], strides = [1, 1]} : vector<8x128xf32> to vector<8x32xf32>
    %27 = vector.extract_strided_slice %25 {offsets = [0, 32], sizes = [8, 32], strides = [1, 1]} : vector<8x128xf32> to vector<8x32xf32>
    %28 = vector.extract_strided_slice %25 {offsets = [0, 64], sizes = [8, 32], strides = [1, 1]} : vector<8x128xf32> to vector<8x32xf32>
    %29 = vector.extract_strided_slice %25 {offsets = [0, 96], sizes = [8, 32], strides = [1, 1]} : vector<8x128xf32> to vector<8x32xf32>
    %30 = arith.mulf %27, %5 : vector<8x32xf32>
    %31 = arith.mulf %26, %28 : vector<8x32xf32>
    %32 = arith.addf %30, %31 : vector<8x32xf32>
    %33 = math.tanh %32 : vector<8x32xf32>
    %34 = arith.mulf %29, %33 : vector<8x32xf32>
    %35 = arith.truncf %34 : vector<8x32xf32> to vector<8x32xbf16>
    %36 = arith.index_cast %c0_i32_6 : i32 to index
    %c0_10 = arith.constant 0 : index
    %c0_11 = arith.constant 0 : index
    %37 = vector.load %arg6[%36, %c0_10, %c0_11] : memref<8x8x32xbf16, #tpu.memory_space<vmem>>, vector<1x8x32xbf16>
    %38 = vector.shape_cast %37 : vector<1x8x32xbf16> to vector<8x32xbf16>
    %39 = vector.shape_cast %35 : vector<8x32xbf16> to vector<1x8x32xbf16>
    tpu.vector_store %arg6[%36, %c0_10, %c0_11], %39 {strides = array<i32>} : memref<8x8x32xbf16, #tpu.memory_space<vmem>>, vector<1x8x32xbf16>,
    %c1_i32 = arith.constant 1 : i32
    %40 = arith.index_cast %c1_i32 : i32 to index
    %c0_12 = arith.constant 0 : index
    %c0_13 = arith.constant 0 : index
    %41 = vector.load %arg2[%40, %c0_12, %c0_13] : memref<8x8x128xbf16, #tpu.memory_space<vmem>>, vector<1x8x128xbf16>
    %42 = vector.shape_cast %41 : vector<1x8x128xbf16> to vector<8x128xbf16>
    %43 = arith.extf %42 : vector<8x128xbf16> to vector<8x128xf32>
    %44 = arith.truncf %34 : vector<8x32xf32> to vector<8x32xbf16>
    %cst_14 = arith.constant dense<0.000000e+00> : vector<8x128xf32>
    %45 = tpu.matmul %44, %3, %cst_14 {dimension_numbers = #tpu.dot_dimension_numbers<[1], [0], [0], [1], [0, 0, 1, 1], [], []>} : vector<8x32xbf16>, vector<32x128xbf16>, vector<8x128xf32> -> vector<8x128xf32>
    %46 = arith.addf %43, %45 : vector<8x128xf32>
    %47 = arith.negf %46 : vector<8x128xf32>
    %48 = math.exp %47 : vector<8x128xf32>
    %cst_15 = arith.constant 1.000000e+00 : f32
    %49 = vector.broadcast %cst_15 : f32 to vector<8x128xf32>
    %50 = arith.addf %49, %48 : vector<8x128xf32>
    %51 = arith.divf %49, %50 : vector<8x128xf32>
    %52 = math.tanh %46 : vector<8x128xf32>
    %53 = tpu.iota {dimensions = array<i32: 1>} : vector<8x128xi32>
    %c64_i32_16 = arith.constant 64 : i32
    %54 = vector.broadcast %c64_i32_16 : i32 to vector<8x128xi32>
    %55 = arith.cmpi sge, %53, %54 : vector<8x128xi32>
    %c96_i32_17 = arith.constant 96 : i32
    %56 = vector.broadcast %c96_i32_17 : i32 to vector<8x128xi32>
    %57 = arith.cmpi slt, %53, %56 : vector<8x128xi32>
    %58 = arith.andi %55, %57 : vector<8x128xi1>
    %59 = arith.select %58, %52, %51 : vector<8x128xi1>, vector<8x128xf32>
    %60 = vector.extract_strided_slice %59 {offsets = [0, 0], sizes = [8, 32], strides = [1, 1]} : vector<8x128xf32> to vector<8x32xf32>
    %61 = vector.extract_strided_slice %59 {offsets = [0, 32], sizes = [8, 32], strides = [1, 1]} : vector<8x128xf32> to vector<8x32xf32>
    %62 = vector.extract_strided_slice %59 {offsets = [0, 64], sizes = [8, 32], strides = [1, 1]} : vector<8x128xf32> to vector<8x32xf32>
    %63 = vector.extract_strided_slice %59 {offsets = [0, 96], sizes = [8, 32], strides = [1, 1]} : vector<8x128xf32> to vector<8x32xf32>
    %64 = arith.mulf %61, %32 : vector<8x32xf32>
    %65 = arith.mulf %60, %62 : vector<8x32xf32>
    %66 = arith.addf %64, %65 : vector<8x32xf32>
    %67 = math.tanh %66 : vector<8x32xf32>
    %68 = arith.mulf %63, %67 : vector<8x32xf32>
    %69 = arith.truncf %68 : vector<8x32xf32> to vector<8x32xbf16>
    %70 = arith.index_cast %c1_i32 : i32 to index
    %c0_18 = arith.constant 0 : index
    %c0_19 = arith.constant 0 : index
    %71 = vector.load %arg6[%70, %c0_18, %c0_19] : memref<8x8x32xbf16, #tpu.memory_space<vmem>>, vector<1x8x32xbf16>
    %72 = vector.shape_cast %71 : vector<1x8x32xbf16> to vector<8x32xbf16>
    %73 = vector.shape_cast %69 : vector<8x32xbf16> to vector<1x8x32xbf16>
    tpu.vector_store %arg6[%70, %c0_18, %c0_19], %73 {strides = array<i32>} : memref<8x8x32xbf16, #tpu.memory_space<vmem>>, vector<1x8x32xbf16>,
    %c2_i32 = arith.constant 2 : i32
    %74 = arith.index_cast %c2_i32 : i32 to index
    %c0_20 = arith.constant 0 : index
    %c0_21 = arith.constant 0 : index
    %75 = vector.load %arg2[%74, %c0_20, %c0_21] : memref<8x8x128xbf16, #tpu.memory_space<vmem>>, vector<1x8x128xbf16>
    %76 = vector.shape_cast %75 : vector<1x8x128xbf16> to vector<8x128xbf16>
    %77 = arith.extf %76 : vector<8x128xbf16> to vector<8x128xf32>
    %78 = arith.truncf %68 : vector<8x32xf32> to vector<8x32xbf16>
    %cst_22 = arith.constant dense<0.000000e+00> : vector<8x128xf32>
    %79 = tpu.matmul %78, %3, %cst_22 {dimension_numbers = #tpu.dot_dimension_numbers<[1], [0], [0], [1], [0, 0, 1, 1], [], []>} : vector<8x32xbf16>, vector<32x128xbf16>, vector<8x128xf32> -> vector<8x128xf32>
    %80 = arith.addf %77, %79 : vector<8x128xf32>
    %81 = arith.negf %80 : vector<8x128xf32>
    %82 = math.exp %81 : vector<8x128xf32>
    %cst_23 = arith.constant 1.000000e+00 : f32
    %83 = vector.broadcast %cst_23 : f32 to vector<8x128xf32>
    %84 = arith.addf %83, %82 : vector<8x128xf32>
    %85 = arith.divf %83, %84 : vector<8x128xf32>
    %86 = math.tanh %80 : vector<8x128xf32>
    %87 = tpu.iota {dimensions = array<i32: 1>} : vector<8x128xi32>
    %c64_i32_24 = arith.constant 64 : i32
    %88 = vector.broadcast %c64_i32_24 : i32 to vector<8x128xi32>
    %89 = arith.cmpi sge, %87, %88 : vector<8x128xi32>
    %c96_i32_25 = arith.constant 96 : i32
    %90 = vector.broadcast %c96_i32_25 : i32 to vector<8x128xi32>
    %91 = arith.cmpi slt, %87, %90 : vector<8x128xi32>
    %92 = arith.andi %89, %91 : vector<8x128xi1>
    %93 = arith.select %92, %86, %85 : vector<8x128xi1>, vector<8x128xf32>
    %94 = vector.extract_strided_slice %93 {offsets = [0, 0], sizes = [8, 32], strides = [1, 1]} : vector<8x128xf32> to vector<8x32xf32>
    %95 = vector.extract_strided_slice %93 {offsets = [0, 32], sizes = [8, 32], strides = [1, 1]} : vector<8x128xf32> to vector<8x32xf32>
    %96 = vector.extract_strided_slice %93 {offsets = [0, 64], sizes = [8, 32], strides = [1, 1]} : vector<8x128xf32> to vector<8x32xf32>
    %97 = vector.extract_strided_slice %93 {offsets = [0, 96], sizes = [8, 32], strides = [1, 1]} : vector<8x128xf32> to vector<8x32xf32>
    %98 = arith.mulf %95, %66 : vector<8x32xf32>
    %99 = arith.mulf %94, %96 : vector<8x32xf32>
    %100 = arith.addf %98, %99 : vector<8x32xf32>
    %101 = math.tanh %100 : vector<8x32xf32>
    %102 = arith.mulf %97, %101 : vector<8x32xf32>
    %103 = arith.truncf %102 : vector<8x32xf32> to vector<8x32xbf16>
    %104 = arith.index_cast %c2_i32 : i32 to index
    %c0_26 = arith.constant 0 : index
    %c0_27 = arith.constant 0 : index
    %105 = vector.load %arg6[%104, %c0_26, %c0_27] : memref<8x8x32xbf16, #tpu.memory_space<vmem>>, vector<1x8x32xbf16>
    %106 = vector.shape_cast %105 : vector<1x8x32xbf16> to vector<8x32xbf16>
    %107 = vector.shape_cast %103 : vector<8x32xbf16> to vector<1x8x32xbf16>
    tpu.vector_store %arg6[%104, %c0_26, %c0_27], %107 {strides = array<i32>} : memref<8x8x32xbf16, #tpu.memory_space<vmem>>, vector<1x8x32xbf16>,
    %c3_i32 = arith.constant 3 : i32
    %108 = arith.index_cast %c3_i32 : i32 to index
    %c0_28 = arith.constant 0 : index
    %c0_29 = arith.constant 0 : index
    %109 = vector.load %arg2[%108, %c0_28, %c0_29] : memref<8x8x128xbf16, #tpu.memory_space<vmem>>, vector<1x8x128xbf16>
    %110 = vector.shape_cast %109 : vector<1x8x128xbf16> to vector<8x128xbf16>
    %111 = arith.extf %110 : vector<8x128xbf16> to vector<8x128xf32>
    %112 = arith.truncf %102 : vector<8x32xf32> to vector<8x32xbf16>
    %cst_30 = arith.constant dense<0.000000e+00> : vector<8x128xf32>
    %113 = tpu.matmul %112, %3, %cst_30 {dimension_numbers = #tpu.dot_dimension_numbers<[1], [0], [0], [1], [0, 0, 1, 1], [], []>} : vector<8x32xbf16>, vector<32x128xbf16>, vector<8x128xf32> -> vector<8x128xf32>
    %114 = arith.addf %111, %113 : vector<8x128xf32>
    %115 = arith.negf %114 : vector<8x128xf32>
    %116 = math.exp %115 : vector<8x128xf32>
    %cst_31 = arith.constant 1.000000e+00 : f32
    %117 = vector.broadcast %cst_31 : f32 to vector<8x128xf32>
    %118 = arith.addf %117, %116 : vector<8x128xf32>
    %119 = arith.divf %117, %118 : vector<8x128xf32>
    %120 = math.tanh %114 : vector<8x128xf32>
    %121 = tpu.iota {dimensions = array<i32: 1>} : vector<8x128xi32>
    %c64_i32_32 = arith.constant 64 : i32
    %122 = vector.broadcast %c64_i32_32 : i32 to vector<8x128xi32>
    %123 = arith.cmpi sge, %121, %122 : vector<8x128xi32>
    %c96_i32_33 = arith.constant 96 : i32
    %124 = vector.broadcast %c96_i32_33 : i32 to vector<8x128xi32>
    %125 = arith.cmpi slt, %121, %124 : vector<8x128xi32>
    %126 = arith.andi %123, %125 : vector<8x128xi1>
    %127 = arith.select %126, %120, %119 : vector<8x128xi1>, vector<8x128xf32>
    %128 = vector.extract_strided_slice %127 {offsets = [0, 0], sizes = [8, 32], strides = [1, 1]} : vector<8x128xf32> to vector<8x32xf32>
    %129 = vector.extract_strided_slice %127 {offsets = [0, 32], sizes = [8, 32], strides = [1, 1]} : vector<8x128xf32> to vector<8x32xf32>
    %130 = vector.extract_strided_slice %127 {offsets = [0, 64], sizes = [8, 32], strides = [1, 1]} : vector<8x128xf32> to vector<8x32xf32>
    %131 = vector.extract_strided_slice %127 {offsets = [0, 96], sizes = [8, 32], strides = [1, 1]} : vector<8x128xf32> to vector<8x32xf32>
    %132 = arith.mulf %129, %100 : vector<8x32xf32>
    %133 = arith.mulf %128, %130 : vector<8x32xf32>
    %134 = arith.addf %132, %133 : vector<8x32xf32>
    %135 = math.tanh %134 : vector<8x32xf32>
    %136 = arith.mulf %131, %135 : vector<8x32xf32>
    %137 = arith.truncf %136 : vector<8x32xf32> to vector<8x32xbf16>
    %138 = arith.index_cast %c3_i32 : i32 to index
    %c0_34 = arith.constant 0 : index
    %c0_35 = arith.constant 0 : index
    %139 = vector.load %arg6[%138, %c0_34, %c0_35] : memref<8x8x32xbf16, #tpu.memory_space<vmem>>, vector<1x8x32xbf16>
    %140 = vector.shape_cast %139 : vector<1x8x32xbf16> to vector<8x32xbf16>
    %141 = vector.shape_cast %137 : vector<8x32xbf16> to vector<1x8x32xbf16>
    tpu.vector_store %arg6[%138, %c0_34, %c0_35], %141 {strides = array<i32>} : memref<8x8x32xbf16, #tpu.memory_space<vmem>>, vector<1x8x32xbf16>,
    %c4_i32 = arith.constant 4 : i32
    %142 = arith.index_cast %c4_i32 : i32 to index
    %c0_36 = arith.constant 0 : index
    %c0_37 = arith.constant 0 : index
    %143 = vector.load %arg2[%142, %c0_36, %c0_37] : memref<8x8x128xbf16, #tpu.memory_space<vmem>>, vector<1x8x128xbf16>
    %144 = vector.shape_cast %143 : vector<1x8x128xbf16> to vector<8x128xbf16>
    %145 = arith.extf %144 : vector<8x128xbf16> to vector<8x128xf32>
    %146 = arith.truncf %136 : vector<8x32xf32> to vector<8x32xbf16>
    %cst_38 = arith.constant dense<0.000000e+00> : vector<8x128xf32>
    %147 = tpu.matmul %146, %3, %cst_38 {dimension_numbers = #tpu.dot_dimension_numbers<[1], [0], [0], [1], [0, 0, 1, 1], [], []>} : vector<8x32xbf16>, vector<32x128xbf16>, vector<8x128xf32> -> vector<8x128xf32>
    %148 = arith.addf %145, %147 : vector<8x128xf32>
    %149 = arith.negf %148 : vector<8x128xf32>
    %150 = math.exp %149 : vector<8x128xf32>
    %cst_39 = arith.constant 1.000000e+00 : f32
    %151 = vector.broadcast %cst_39 : f32 to vector<8x128xf32>
    %152 = arith.addf %151, %150 : vector<8x128xf32>
    %153 = arith.divf %151, %152 : vector<8x128xf32>
    %154 = math.tanh %148 : vector<8x128xf32>
    %155 = tpu.iota {dimensions = array<i32: 1>} : vector<8x128xi32>
    %c64_i32_40 = arith.constant 64 : i32
    %156 = vector.broadcast %c64_i32_40 : i32 to vector<8x128xi32>
    %157 = arith.cmpi sge, %155, %156 : vector<8x128xi32>
    %c96_i32_41 = arith.constant 96 : i32
    %158 = vector.broadcast %c96_i32_41 : i32 to vector<8x128xi32>
    %159 = arith.cmpi slt, %155, %158 : vector<8x128xi32>
    %160 = arith.andi %157, %159 : vector<8x128xi1>
    %161 = arith.select %160, %154, %153 : vector<8x128xi1>, vector<8x128xf32>
    %162 = vector.extract_strided_slice %161 {offsets = [0, 0], sizes = [8, 32], strides = [1, 1]} : vector<8x128xf32> to vector<8x32xf32>
    %163 = vector.extract_strided_slice %161 {offsets = [0, 32], sizes = [8, 32], strides = [1, 1]} : vector<8x128xf32> to vector<8x32xf32>
    %164 = vector.extract_strided_slice %161 {offsets = [0, 64], sizes = [8, 32], strides = [1, 1]} : vector<8x128xf32> to vector<8x32xf32>
    %165 = vector.extract_strided_slice %161 {offsets = [0, 96], sizes = [8, 32], strides = [1, 1]} : vector<8x128xf32> to vector<8x32xf32>
    %166 = arith.mulf %163, %134 : vector<8x32xf32>
    %167 = arith.mulf %162, %164 : vector<8x32xf32>
    %168 = arith.addf %166, %167 : vector<8x32xf32>
    %169 = math.tanh %168 : vector<8x32xf32>
    %170 = arith.mulf %165, %169 : vector<8x32xf32>
    %171 = arith.truncf %170 : vector<8x32xf32> to vector<8x32xbf16>
    %172 = arith.index_cast %c4_i32 : i32 to index
    %c0_42 = arith.constant 0 : index
    %c0_43 = arith.constant 0 : index
    %173 = vector.load %arg6[%172, %c0_42, %c0_43] : memref<8x8x32xbf16, #tpu.memory_space<vmem>>, vector<1x8x32xbf16>
    %174 = vector.shape_cast %173 : vector<1x8x32xbf16> to vector<8x32xbf16>
    %175 = vector.shape_cast %171 : vector<8x32xbf16> to vector<1x8x32xbf16>
    tpu.vector_store %arg6[%172, %c0_42, %c0_43], %175 {strides = array<i32>} : memref<8x8x32xbf16, #tpu.memory_space<vmem>>, vector<1x8x32xbf16>,
    %c5_i32 = arith.constant 5 : i32
    %176 = arith.index_cast %c5_i32 : i32 to index
    %c0_44 = arith.constant 0 : index
    %c0_45 = arith.constant 0 : index
    %177 = vector.load %arg2[%176, %c0_44, %c0_45] : memref<8x8x128xbf16, #tpu.memory_space<vmem>>, vector<1x8x128xbf16>
    %178 = vector.shape_cast %177 : vector<1x8x128xbf16> to vector<8x128xbf16>
    %179 = arith.extf %178 : vector<8x128xbf16> to vector<8x128xf32>
    %180 = arith.truncf %170 : vector<8x32xf32> to vector<8x32xbf16>
    %cst_46 = arith.constant dense<0.000000e+00> : vector<8x128xf32>
    %181 = tpu.matmul %180, %3, %cst_46 {dimension_numbers = #tpu.dot_dimension_numbers<[1], [0], [0], [1], [0, 0, 1, 1], [], []>} : vector<8x32xbf16>, vector<32x128xbf16>, vector<8x128xf32> -> vector<8x128xf32>
    %182 = arith.addf %179, %181 : vector<8x128xf32>
    %183 = arith.negf %182 : vector<8x128xf32>
    %184 = math.exp %183 : vector<8x128xf32>
    %cst_47 = arith.constant 1.000000e+00 : f32
    %185 = vector.broadcast %cst_47 : f32 to vector<8x128xf32>
    %186 = arith.addf %185, %184 : vector<8x128xf32>
    %187 = arith.divf %185, %186 : vector<8x128xf32>
    %188 = math.tanh %182 : vector<8x128xf32>
    %189 = tpu.iota {dimensions = array<i32: 1>} : vector<8x128xi32>
    %c64_i32_48 = arith.constant 64 : i32
    %190 = vector.broadcast %c64_i32_48 : i32 to vector<8x128xi32>
    %191 = arith.cmpi sge, %189, %190 : vector<8x128xi32>
    %c96_i32_49 = arith.constant 96 : i32
    %192 = vector.broadcast %c96_i32_49 : i32 to vector<8x128xi32>
    %193 = arith.cmpi slt, %189, %192 : vector<8x128xi32>
    %194 = arith.andi %191, %193 : vector<8x128xi1>
    %195 = arith.select %194, %188, %187 : vector<8x128xi1>, vector<8x128xf32>
    %196 = vector.extract_strided_slice %195 {offsets = [0, 0], sizes = [8, 32], strides = [1, 1]} : vector<8x128xf32> to vector<8x32xf32>
    %197 = vector.extract_strided_slice %195 {offsets = [0, 32], sizes = [8, 32], strides = [1, 1]} : vector<8x128xf32> to vector<8x32xf32>
    %198 = vector.extract_strided_slice %195 {offsets = [0, 64], sizes = [8, 32], strides = [1, 1]} : vector<8x128xf32> to vector<8x32xf32>
    %199 = vector.extract_strided_slice %195 {offsets = [0, 96], sizes = [8, 32], strides = [1, 1]} : vector<8x128xf32> to vector<8x32xf32>
    %200 = arith.mulf %197, %168 : vector<8x32xf32>
    %201 = arith.mulf %196, %198 : vector<8x32xf32>
    %202 = arith.addf %200, %201 : vector<8x32xf32>
    %203 = math.tanh %202 : vector<8x32xf32>
    %204 = arith.mulf %199, %203 : vector<8x32xf32>
    %205 = arith.truncf %204 : vector<8x32xf32> to vector<8x32xbf16>
    %206 = arith.index_cast %c5_i32 : i32 to index
    %c0_50 = arith.constant 0 : index
    %c0_51 = arith.constant 0 : index
    %207 = vector.load %arg6[%206, %c0_50, %c0_51] : memref<8x8x32xbf16, #tpu.memory_space<vmem>>, vector<1x8x32xbf16>
    %208 = vector.shape_cast %207 : vector<1x8x32xbf16> to vector<8x32xbf16>
    %209 = vector.shape_cast %205 : vector<8x32xbf16> to vector<1x8x32xbf16>
    tpu.vector_store %arg6[%206, %c0_50, %c0_51], %209 {strides = array<i32>} : memref<8x8x32xbf16, #tpu.memory_space<vmem>>, vector<1x8x32xbf16>,
    %c6_i32 = arith.constant 6 : i32
    %210 = arith.index_cast %c6_i32 : i32 to index
    %c0_52 = arith.constant 0 : index
    %c0_53 = arith.constant 0 : index
    %211 = vector.load %arg2[%210, %c0_52, %c0_53] : memref<8x8x128xbf16, #tpu.memory_space<vmem>>, vector<1x8x128xbf16>
    %212 = vector.shape_cast %211 : vector<1x8x128xbf16> to vector<8x128xbf16>
    %213 = arith.extf %212 : vector<8x128xbf16> to vector<8x128xf32>
    %214 = arith.truncf %204 : vector<8x32xf32> to vector<8x32xbf16>
    %cst_54 = arith.constant dense<0.000000e+00> : vector<8x128xf32>
    %215 = tpu.matmul %214, %3, %cst_54 {dimension_numbers = #tpu.dot_dimension_numbers<[1], [0], [0], [1], [0, 0, 1, 1], [], []>} : vector<8x32xbf16>, vector<32x128xbf16>, vector<8x128xf32> -> vector<8x128xf32>
    %216 = arith.addf %213, %215 : vector<8x128xf32>
    %217 = arith.negf %216 : vector<8x128xf32>
    %218 = math.exp %217 : vector<8x128xf32>
    %cst_55 = arith.constant 1.000000e+00 : f32
    %219 = vector.broadcast %cst_55 : f32 to vector<8x128xf32>
    %220 = arith.addf %219, %218 : vector<8x128xf32>
    %221 = arith.divf %219, %220 : vector<8x128xf32>
    %222 = math.tanh %216 : vector<8x128xf32>
    %223 = tpu.iota {dimensions = array<i32: 1>} : vector<8x128xi32>
    %c64_i32_56 = arith.constant 64 : i32
    %224 = vector.broadcast %c64_i32_56 : i32 to vector<8x128xi32>
    %225 = arith.cmpi sge, %223, %224 : vector<8x128xi32>
    %c96_i32_57 = arith.constant 96 : i32
    %226 = vector.broadcast %c96_i32_57 : i32 to vector<8x128xi32>
    %227 = arith.cmpi slt, %223, %226 : vector<8x128xi32>
    %228 = arith.andi %225, %227 : vector<8x128xi1>
    %229 = arith.select %228, %222, %221 : vector<8x128xi1>, vector<8x128xf32>
    %230 = vector.extract_strided_slice %229 {offsets = [0, 0], sizes = [8, 32], strides = [1, 1]} : vector<8x128xf32> to vector<8x32xf32>
    %231 = vector.extract_strided_slice %229 {offsets = [0, 32], sizes = [8, 32], strides = [1, 1]} : vector<8x128xf32> to vector<8x32xf32>
    %232 = vector.extract_strided_slice %229 {offsets = [0, 64], sizes = [8, 32], strides = [1, 1]} : vector<8x128xf32> to vector<8x32xf32>
    %233 = vector.extract_strided_slice %229 {offsets = [0, 96], sizes = [8, 32], strides = [1, 1]} : vector<8x128xf32> to vector<8x32xf32>
    %234 = arith.mulf %231, %202 : vector<8x32xf32>
    %235 = arith.mulf %230, %232 : vector<8x32xf32>
    %236 = arith.addf %234, %235 : vector<8x32xf32>
    %237 = math.tanh %236 : vector<8x32xf32>
    %238 = arith.mulf %233, %237 : vector<8x32xf32>
    %239 = arith.truncf %238 : vector<8x32xf32> to vector<8x32xbf16>
    %240 = arith.index_cast %c6_i32 : i32 to index
    %c0_58 = arith.constant 0 : index
    %c0_59 = arith.constant 0 : index
    %241 = vector.load %arg6[%240, %c0_58, %c0_59] : memref<8x8x32xbf16, #tpu.memory_space<vmem>>, vector<1x8x32xbf16>
    %242 = vector.shape_cast %241 : vector<1x8x32xbf16> to vector<8x32xbf16>
    %243 = vector.shape_cast %239 : vector<8x32xbf16> to vector<1x8x32xbf16>
    tpu.vector_store %arg6[%240, %c0_58, %c0_59], %243 {strides = array<i32>} : memref<8x8x32xbf16, #tpu.memory_space<vmem>>, vector<1x8x32xbf16>,
    %c7_i32 = arith.constant 7 : i32
    %244 = arith.index_cast %c7_i32 : i32 to index
    %c0_60 = arith.constant 0 : index
    %c0_61 = arith.constant 0 : index
    %245 = vector.load %arg2[%244, %c0_60, %c0_61] : memref<8x8x128xbf16, #tpu.memory_space<vmem>>, vector<1x8x128xbf16>
    %246 = vector.shape_cast %245 : vector<1x8x128xbf16> to vector<8x128xbf16>
    %247 = arith.extf %246 : vector<8x128xbf16> to vector<8x128xf32>
    %248 = arith.truncf %238 : vector<8x32xf32> to vector<8x32xbf16>
    %cst_62 = arith.constant dense<0.000000e+00> : vector<8x128xf32>
    %249 = tpu.matmul %248, %3, %cst_62 {dimension_numbers = #tpu.dot_dimension_numbers<[1], [0], [0], [1], [0, 0, 1, 1], [], []>} : vector<8x32xbf16>, vector<32x128xbf16>, vector<8x128xf32> -> vector<8x128xf32>
    %250 = arith.addf %247, %249 : vector<8x128xf32>
    %251 = arith.negf %250 : vector<8x128xf32>
    %252 = math.exp %251 : vector<8x128xf32>
    %cst_63 = arith.constant 1.000000e+00 : f32
    %253 = vector.broadcast %cst_63 : f32 to vector<8x128xf32>
    %254 = arith.addf %253, %252 : vector<8x128xf32>
    %255 = arith.divf %253, %254 : vector<8x128xf32>
    %256 = math.tanh %250 : vector<8x128xf32>
    %257 = tpu.iota {dimensions = array<i32: 1>} : vector<8x128xi32>
    %c64_i32_64 = arith.constant 64 : i32
    %258 = vector.broadcast %c64_i32_64 : i32 to vector<8x128xi32>
    %259 = arith.cmpi sge, %257, %258 : vector<8x128xi32>
    %c96_i32_65 = arith.constant 96 : i32
    %260 = vector.broadcast %c96_i32_65 : i32 to vector<8x128xi32>
    %261 = arith.cmpi slt, %257, %260 : vector<8x128xi32>
    %262 = arith.andi %259, %261 : vector<8x128xi1>
    %263 = arith.select %262, %256, %255 : vector<8x128xi1>, vector<8x128xf32>
    %264 = vector.extract_strided_slice %263 {offsets = [0, 0], sizes = [8, 32], strides = [1, 1]} : vector<8x128xf32> to vector<8x32xf32>
    %265 = vector.extract_strided_slice %263 {offsets = [0, 32], sizes = [8, 32], strides = [1, 1]} : vector<8x128xf32> to vector<8x32xf32>
    %266 = vector.extract_strided_slice %263 {offsets = [0, 64], sizes = [8, 32], strides = [1, 1]} : vector<8x128xf32> to vector<8x32xf32>
    %267 = vector.extract_strided_slice %263 {offsets = [0, 96], sizes = [8, 32], strides = [1, 1]} : vector<8x128xf32> to vector<8x32xf32>
    %268 = arith.mulf %265, %236 : vector<8x32xf32>
    %269 = arith.mulf %264, %266 : vector<8x32xf32>
    %270 = arith.addf %268, %269 : vector<8x32xf32>
    %271 = math.tanh %270 : vector<8x32xf32>
    %272 = arith.mulf %267, %271 : vector<8x32xf32>
    %273 = arith.truncf %272 : vector<8x32xf32> to vector<8x32xbf16>
    %274 = arith.index_cast %c7_i32 : i32 to index
    %c0_66 = arith.constant 0 : index
    %c0_67 = arith.constant 0 : index
    %275 = vector.load %arg6[%274, %c0_66, %c0_67] : memref<8x8x32xbf16, #tpu.memory_space<vmem>>, vector<1x8x32xbf16>
    %276 = vector.shape_cast %275 : vector<1x8x32xbf16> to vector<8x32xbf16>
    %277 = vector.shape_cast %273 : vector<8x32xbf16> to vector<1x8x32xbf16>
    tpu.vector_store %arg6[%274, %c0_66, %c0_67], %277 {strides = array<i32>} : memref<8x8x32xbf16, #tpu.memory_space<vmem>>, vector<1x8x32xbf16>,
    %c8_i32 = arith.constant 8 : i32
    %c0_68 = arith.constant 0 : index
    %c0_69 = arith.constant 0 : index
    %278 = vector.load %arg9[%c0_68, %c0_69] : memref<8x32xf32, #tpu.memory_space<vmem>>, vector<8x32xf32>
    tpu.vector_store %arg9[%c0_68, %c0_69], %272 {strides = array<i32>} : memref<8x32xf32, #tpu.memory_space<vmem>>, vector<8x32xf32>,
    %c0_70 = arith.constant 0 : index
    %c0_71 = arith.constant 0 : index
    %279 = vector.load %arg10[%c0_70, %c0_71] : memref<8x32xf32, #tpu.memory_space<vmem>>, vector<8x32xf32>
    tpu.vector_store %arg10[%c0_70, %c0_71], %270 {strides = array<i32>} : memref<8x32xf32, #tpu.memory_space<vmem>>, vector<8x32xf32>,
    %c0_i32_72 = arith.constant 0 : i32
    %280 = arith.cmpi eq, %arg1, %c0_i32_72 : i32
    %281 = arith.extui %280 : i1 to i32
    %c0_i32_73 = arith.constant 0 : i32
    %282 = arith.cmpi ne, %281, %c0_i32_73 : i32
    scf.if %282 {
      %c0_74 = arith.constant 0 : index
      %c0_75 = arith.constant 0 : index
      %283 = vector.load %arg7[%c0_74, %c0_75] : memref<8x32xf32, #tpu.memory_space<vmem>>, vector<8x32xf32>
      tpu.vector_store %arg7[%c0_74, %c0_75], %272 {strides = array<i32>} : memref<8x32xf32, #tpu.memory_space<vmem>>, vector<8x32xf32>,
      %c0_76 = arith.constant 0 : index
      %c0_77 = arith.constant 0 : index
      %284 = vector.load %arg8[%c0_76, %c0_77] : memref<8x32xf32, #tpu.memory_space<vmem>>, vector<8x32xf32>
      tpu.vector_store %arg8[%c0_76, %c0_77], %270 {strides = array<i32>} : memref<8x32xf32, #tpu.memory_space<vmem>>, vector<8x32xf32>,
    } else {
    }
    return
  }
  func.func @transform_0(%arg0: i32, %arg1: i32) -> (i32, i32, i32) {
    %c0_i32 = arith.constant 0 : i32
    %c0_i32_0 = arith.constant 0 : i32
    return %arg1, %arg0, %c0_i32 : i32, i32, i32
  }
  func.func @transform_1(%arg0: i32, %arg1: i32) -> (i32, i32) {
    %c0_i32 = arith.constant 0 : i32
    %c0_i32_0 = arith.constant 0 : i32
    %c0_i32_1 = arith.constant 0 : i32
    return %c0_i32, %c0_i32_0 : i32, i32
  }
  func.func @transform_2(%arg0: i32, %arg1: i32) -> (i32, i32) {
    %c0_i32 = arith.constant 0 : i32
    %c0_i32_0 = arith.constant 0 : i32
    return %arg0, %c0_i32 : i32, i32
  }
  func.func @transform_3(%arg0: i32, %arg1: i32) -> (i32, i32) {
    %c0_i32 = arith.constant 0 : i32
    %c0_i32_0 = arith.constant 0 : i32
    return %arg0, %c0_i32 : i32, i32
  }
  func.func @transform_4(%arg0: i32, %arg1: i32) -> (i32, i32, i32) {
    %c0_i32 = arith.constant 0 : i32
    %c0_i32_0 = arith.constant 0 : i32
    return %arg1, %arg0, %c0_i32 : i32, i32, i32
  }
  func.func @transform_5(%arg0: i32, %arg1: i32) -> (i32, i32) {
    %c0_i32 = arith.constant 0 : i32
    %c0_i32_0 = arith.constant 0 : i32
    return %arg0, %c0_i32 : i32, i32
  }
  func.func @transform_6(%arg0: i32, %arg1: i32) -> (i32, i32) {
    %c0_i32 = arith.constant 0 : i32
    %c0_i32_0 = arith.constant 0 : i32
    return %arg0, %c0_i32 : i32, i32
  }
}

module attributes {stable_mosaic.version = 11 : i64} {
  func.func @kernel(%arg0: i32, %arg1: i32, %arg2: memref<8x8x128xbf16, #tpu.memory_space<vmem>>, %arg3: memref<32x128xbf16, #tpu.memory_space<vmem>>, %arg4: memref<8x32xf32, #tpu.memory_space<vmem>>, %arg5: memref<8x32xf32, #tpu.memory_space<vmem>>, %arg6: memref<32x4xbf16, #tpu.memory_space<vmem>>, %arg7: memref<1x4xf32, #tpu.memory_space<vmem>>, %arg8: memref<8x8x4xf32, #tpu.memory_space<vmem>>, %arg9: memref<8x32xf32, #tpu.memory_space<vmem>>, %arg10: memref<8x32xf32, #tpu.memory_space<vmem>>, %arg11: memref<8x32xf32, #tpu.memory_space<vmem>>, %arg12: memref<8x32xf32, #tpu.memory_space<vmem>>, %arg13: memref<8x8x32xf32, #tpu.memory_space<vmem>>) attributes {dimension_semantics = [#tpu.dimension_semantics<parallel>, #tpu.dimension_semantics<arbitrary>], iteration_bounds = array<i64: 1, 1>, scalar_prefetch = 0 : i64, scratch_operands = 3 : i64, tpu.core_type = #tpu.core_type<tc>, window_params = [{transform_indices = @transform_0, window_bounds = array<i64: 8, 8, 128>}, {pipeline_mode = #tpu.pipeline_mode<synchronous>, transform_indices = @transform_1, window_bounds = array<i64: 32, 128>}, {transform_indices = @transform_2, window_bounds = array<i64: 8, 32>}, {transform_indices = @transform_3, window_bounds = array<i64: 8, 32>}, {pipeline_mode = #tpu.pipeline_mode<synchronous>, transform_indices = @transform_4, window_bounds = array<i64: 32, 4>}, {pipeline_mode = #tpu.pipeline_mode<synchronous>, transform_indices = @transform_5, window_bounds = array<i64: 1, 4>}, {transform_indices = @transform_6, window_bounds = array<i64: 8, 8, 4>}, {transform_indices = @transform_7, window_bounds = array<i64: 8, 32>}, {transform_indices = @transform_8, window_bounds = array<i64: 8, 32>}]} {
    %c0_i32 = arith.constant 0 : i32
    %0 = arith.cmpi eq, %arg1, %c0_i32 : i32
    %1 = arith.extui %0 : i1 to i32
    %c0_i32_0 = arith.constant 0 : i32
    %2 = arith.cmpi ne, %1, %c0_i32_0 : i32
    scf.if %2 {
      %c0_85 = arith.constant 0 : index
      %c0_86 = arith.constant 0 : index
      %287 = vector.load %arg4[%c0_85, %c0_86] : memref<8x32xf32, #tpu.memory_space<vmem>>, vector<8x32xf32>
      %c0_87 = arith.constant 0 : index
      %c0_88 = arith.constant 0 : index
      %288 = vector.load %arg11[%c0_87, %c0_88] : memref<8x32xf32, #tpu.memory_space<vmem>>, vector<8x32xf32>
      tpu.vector_store %arg11[%c0_87, %c0_88], %287 {strides = array<i32>} : memref<8x32xf32, #tpu.memory_space<vmem>>, vector<8x32xf32>,
      %c0_89 = arith.constant 0 : index
      %c0_90 = arith.constant 0 : index
      %289 = vector.load %arg5[%c0_89, %c0_90] : memref<8x32xf32, #tpu.memory_space<vmem>>, vector<8x32xf32>
      %c0_91 = arith.constant 0 : index
      %c0_92 = arith.constant 0 : index
      %290 = vector.load %arg12[%c0_91, %c0_92] : memref<8x32xf32, #tpu.memory_space<vmem>>, vector<8x32xf32>
      tpu.vector_store %arg12[%c0_91, %c0_92], %289 {strides = array<i32>} : memref<8x32xf32, #tpu.memory_space<vmem>>, vector<8x32xf32>,
    } else {
    }
    %c0 = arith.constant 0 : index
    %c0_1 = arith.constant 0 : index
    %3 = vector.load %arg3[%c0, %c0_1] : memref<32x128xbf16, #tpu.memory_space<vmem>>, vector<32x128xbf16>
    %c0_2 = arith.constant 0 : index
    %c0_3 = arith.constant 0 : index
    %4 = vector.load %arg11[%c0_2, %c0_3] : memref<8x32xf32, #tpu.memory_space<vmem>>, vector<8x32xf32>
    %c0_4 = arith.constant 0 : index
    %c0_5 = arith.constant 0 : index
    %5 = vector.load %arg12[%c0_4, %c0_5] : memref<8x32xf32, #tpu.memory_space<vmem>>, vector<8x32xf32>
    %c0_i32_6 = arith.constant 0 : i32
    %6 = arith.index_cast %c0_i32_6 : i32 to index
    %c0_7 = arith.constant 0 : index
    %c0_8 = arith.constant 0 : index
    %7 = vector.load %arg2[%6, %c0_7, %c0_8] : memref<8x8x128xbf16, #tpu.memory_space<vmem>>, vector<1x8x128xbf16>
    %8 = vector.shape_cast %7 : vector<1x8x128xbf16> to vector<8x128xbf16>
    %9 = arith.extf %8 : vector<8x128xbf16> to vector<8x128xf32>
    %10 = arith.truncf %4 : vector<8x32xf32> to vector<8x32xbf16>
    %cst = arith.constant dense<0.000000e+00> : vector<8x128xf32>
    %11 = tpu.matmul %10, %3, %cst {dimension_numbers = #tpu.dot_dimension_numbers<[1], [0], [0], [1], [0, 0, 1, 1], [], []>} : vector<8x32xbf16>, vector<32x128xbf16>, vector<8x128xf32> -> vector<8x128xf32>
    %12 = arith.addf %9, %11 : vector<8x128xf32>
    %13 = arith.negf %12 : vector<8x128xf32>
    %14 = math.exp %13 : vector<8x128xf32>
    %cst_9 = arith.constant 1.000000e+00 : f32
    %15 = vector.broadcast %cst_9 : f32 to vector<8x128xf32>
    %16 = arith.addf %15, %14 : vector<8x128xf32>
    %17 = arith.divf %15, %16 : vector<8x128xf32>
    %18 = math.tanh %12 : vector<8x128xf32>
    %19 = tpu.iota {dimensions = array<i32: 1>} : vector<8x128xi32>
    %c64_i32 = arith.constant 64 : i32
    %20 = vector.broadcast %c64_i32 : i32 to vector<8x128xi32>
    %21 = arith.cmpi sge, %19, %20 : vector<8x128xi32>
    %c96_i32 = arith.constant 96 : i32
    %22 = vector.broadcast %c96_i32 : i32 to vector<8x128xi32>
    %23 = arith.cmpi slt, %19, %22 : vector<8x128xi32>
    %24 = arith.andi %21, %23 : vector<8x128xi1>
    %25 = arith.select %24, %18, %17 : vector<8x128xi1>, vector<8x128xf32>
    %26 = vector.extract_strided_slice %25 {offsets = [0, 0], sizes = [8, 32], strides = [1, 1]} : vector<8x128xf32> to vector<8x32xf32>
    %27 = vector.extract_strided_slice %25 {offsets = [0, 32], sizes = [8, 32], strides = [1, 1]} : vector<8x128xf32> to vector<8x32xf32>
    %28 = vector.extract_strided_slice %25 {offsets = [0, 64], sizes = [8, 32], strides = [1, 1]} : vector<8x128xf32> to vector<8x32xf32>
    %29 = vector.extract_strided_slice %25 {offsets = [0, 96], sizes = [8, 32], strides = [1, 1]} : vector<8x128xf32> to vector<8x32xf32>
    %30 = arith.mulf %27, %5 : vector<8x32xf32>
    %31 = arith.mulf %26, %28 : vector<8x32xf32>
    %32 = arith.addf %30, %31 : vector<8x32xf32>
    %33 = math.tanh %32 : vector<8x32xf32>
    %34 = arith.mulf %29, %33 : vector<8x32xf32>
    %35 = arith.index_cast %c0_i32_6 : i32 to index
    %c0_10 = arith.constant 0 : index
    %c0_11 = arith.constant 0 : index
    %36 = vector.load %arg13[%35, %c0_10, %c0_11] : memref<8x8x32xf32, #tpu.memory_space<vmem>>, vector<1x8x32xf32>
    %37 = vector.shape_cast %36 : vector<1x8x32xf32> to vector<8x32xf32>
    %38 = vector.shape_cast %34 : vector<8x32xf32> to vector<1x8x32xf32>
    tpu.vector_store %arg13[%35, %c0_10, %c0_11], %38 {strides = array<i32>} : memref<8x8x32xf32, #tpu.memory_space<vmem>>, vector<1x8x32xf32>,
    %c1_i32 = arith.constant 1 : i32
    %39 = arith.index_cast %c1_i32 : i32 to index
    %c0_12 = arith.constant 0 : index
    %c0_13 = arith.constant 0 : index
    %40 = vector.load %arg2[%39, %c0_12, %c0_13] : memref<8x8x128xbf16, #tpu.memory_space<vmem>>, vector<1x8x128xbf16>
    %41 = vector.shape_cast %40 : vector<1x8x128xbf16> to vector<8x128xbf16>
    %42 = arith.extf %41 : vector<8x128xbf16> to vector<8x128xf32>
    %43 = arith.truncf %34 : vector<8x32xf32> to vector<8x32xbf16>
    %cst_14 = arith.constant dense<0.000000e+00> : vector<8x128xf32>
    %44 = tpu.matmul %43, %3, %cst_14 {dimension_numbers = #tpu.dot_dimension_numbers<[1], [0], [0], [1], [0, 0, 1, 1], [], []>} : vector<8x32xbf16>, vector<32x128xbf16>, vector<8x128xf32> -> vector<8x128xf32>
    %45 = arith.addf %42, %44 : vector<8x128xf32>
    %46 = arith.negf %45 : vector<8x128xf32>
    %47 = math.exp %46 : vector<8x128xf32>
    %cst_15 = arith.constant 1.000000e+00 : f32
    %48 = vector.broadcast %cst_15 : f32 to vector<8x128xf32>
    %49 = arith.addf %48, %47 : vector<8x128xf32>
    %50 = arith.divf %48, %49 : vector<8x128xf32>
    %51 = math.tanh %45 : vector<8x128xf32>
    %52 = tpu.iota {dimensions = array<i32: 1>} : vector<8x128xi32>
    %c64_i32_16 = arith.constant 64 : i32
    %53 = vector.broadcast %c64_i32_16 : i32 to vector<8x128xi32>
    %54 = arith.cmpi sge, %52, %53 : vector<8x128xi32>
    %c96_i32_17 = arith.constant 96 : i32
    %55 = vector.broadcast %c96_i32_17 : i32 to vector<8x128xi32>
    %56 = arith.cmpi slt, %52, %55 : vector<8x128xi32>
    %57 = arith.andi %54, %56 : vector<8x128xi1>
    %58 = arith.select %57, %51, %50 : vector<8x128xi1>, vector<8x128xf32>
    %59 = vector.extract_strided_slice %58 {offsets = [0, 0], sizes = [8, 32], strides = [1, 1]} : vector<8x128xf32> to vector<8x32xf32>
    %60 = vector.extract_strided_slice %58 {offsets = [0, 32], sizes = [8, 32], strides = [1, 1]} : vector<8x128xf32> to vector<8x32xf32>
    %61 = vector.extract_strided_slice %58 {offsets = [0, 64], sizes = [8, 32], strides = [1, 1]} : vector<8x128xf32> to vector<8x32xf32>
    %62 = vector.extract_strided_slice %58 {offsets = [0, 96], sizes = [8, 32], strides = [1, 1]} : vector<8x128xf32> to vector<8x32xf32>
    %63 = arith.mulf %60, %32 : vector<8x32xf32>
    %64 = arith.mulf %59, %61 : vector<8x32xf32>
    %65 = arith.addf %63, %64 : vector<8x32xf32>
    %66 = math.tanh %65 : vector<8x32xf32>
    %67 = arith.mulf %62, %66 : vector<8x32xf32>
    %68 = arith.index_cast %c1_i32 : i32 to index
    %c0_18 = arith.constant 0 : index
    %c0_19 = arith.constant 0 : index
    %69 = vector.load %arg13[%68, %c0_18, %c0_19] : memref<8x8x32xf32, #tpu.memory_space<vmem>>, vector<1x8x32xf32>
    %70 = vector.shape_cast %69 : vector<1x8x32xf32> to vector<8x32xf32>
    %71 = vector.shape_cast %67 : vector<8x32xf32> to vector<1x8x32xf32>
    tpu.vector_store %arg13[%68, %c0_18, %c0_19], %71 {strides = array<i32>} : memref<8x8x32xf32, #tpu.memory_space<vmem>>, vector<1x8x32xf32>,
    %c2_i32 = arith.constant 2 : i32
    %72 = arith.index_cast %c2_i32 : i32 to index
    %c0_20 = arith.constant 0 : index
    %c0_21 = arith.constant 0 : index
    %73 = vector.load %arg2[%72, %c0_20, %c0_21] : memref<8x8x128xbf16, #tpu.memory_space<vmem>>, vector<1x8x128xbf16>
    %74 = vector.shape_cast %73 : vector<1x8x128xbf16> to vector<8x128xbf16>
    %75 = arith.extf %74 : vector<8x128xbf16> to vector<8x128xf32>
    %76 = arith.truncf %67 : vector<8x32xf32> to vector<8x32xbf16>
    %cst_22 = arith.constant dense<0.000000e+00> : vector<8x128xf32>
    %77 = tpu.matmul %76, %3, %cst_22 {dimension_numbers = #tpu.dot_dimension_numbers<[1], [0], [0], [1], [0, 0, 1, 1], [], []>} : vector<8x32xbf16>, vector<32x128xbf16>, vector<8x128xf32> -> vector<8x128xf32>
    %78 = arith.addf %75, %77 : vector<8x128xf32>
    %79 = arith.negf %78 : vector<8x128xf32>
    %80 = math.exp %79 : vector<8x128xf32>
    %cst_23 = arith.constant 1.000000e+00 : f32
    %81 = vector.broadcast %cst_23 : f32 to vector<8x128xf32>
    %82 = arith.addf %81, %80 : vector<8x128xf32>
    %83 = arith.divf %81, %82 : vector<8x128xf32>
    %84 = math.tanh %78 : vector<8x128xf32>
    %85 = tpu.iota {dimensions = array<i32: 1>} : vector<8x128xi32>
    %c64_i32_24 = arith.constant 64 : i32
    %86 = vector.broadcast %c64_i32_24 : i32 to vector<8x128xi32>
    %87 = arith.cmpi sge, %85, %86 : vector<8x128xi32>
    %c96_i32_25 = arith.constant 96 : i32
    %88 = vector.broadcast %c96_i32_25 : i32 to vector<8x128xi32>
    %89 = arith.cmpi slt, %85, %88 : vector<8x128xi32>
    %90 = arith.andi %87, %89 : vector<8x128xi1>
    %91 = arith.select %90, %84, %83 : vector<8x128xi1>, vector<8x128xf32>
    %92 = vector.extract_strided_slice %91 {offsets = [0, 0], sizes = [8, 32], strides = [1, 1]} : vector<8x128xf32> to vector<8x32xf32>
    %93 = vector.extract_strided_slice %91 {offsets = [0, 32], sizes = [8, 32], strides = [1, 1]} : vector<8x128xf32> to vector<8x32xf32>
    %94 = vector.extract_strided_slice %91 {offsets = [0, 64], sizes = [8, 32], strides = [1, 1]} : vector<8x128xf32> to vector<8x32xf32>
    %95 = vector.extract_strided_slice %91 {offsets = [0, 96], sizes = [8, 32], strides = [1, 1]} : vector<8x128xf32> to vector<8x32xf32>
    %96 = arith.mulf %93, %65 : vector<8x32xf32>
    %97 = arith.mulf %92, %94 : vector<8x32xf32>
    %98 = arith.addf %96, %97 : vector<8x32xf32>
    %99 = math.tanh %98 : vector<8x32xf32>
    %100 = arith.mulf %95, %99 : vector<8x32xf32>
    %101 = arith.index_cast %c2_i32 : i32 to index
    %c0_26 = arith.constant 0 : index
    %c0_27 = arith.constant 0 : index
    %102 = vector.load %arg13[%101, %c0_26, %c0_27] : memref<8x8x32xf32, #tpu.memory_space<vmem>>, vector<1x8x32xf32>
    %103 = vector.shape_cast %102 : vector<1x8x32xf32> to vector<8x32xf32>
    %104 = vector.shape_cast %100 : vector<8x32xf32> to vector<1x8x32xf32>
    tpu.vector_store %arg13[%101, %c0_26, %c0_27], %104 {strides = array<i32>} : memref<8x8x32xf32, #tpu.memory_space<vmem>>, vector<1x8x32xf32>,
    %c3_i32 = arith.constant 3 : i32
    %105 = arith.index_cast %c3_i32 : i32 to index
    %c0_28 = arith.constant 0 : index
    %c0_29 = arith.constant 0 : index
    %106 = vector.load %arg2[%105, %c0_28, %c0_29] : memref<8x8x128xbf16, #tpu.memory_space<vmem>>, vector<1x8x128xbf16>
    %107 = vector.shape_cast %106 : vector<1x8x128xbf16> to vector<8x128xbf16>
    %108 = arith.extf %107 : vector<8x128xbf16> to vector<8x128xf32>
    %109 = arith.truncf %100 : vector<8x32xf32> to vector<8x32xbf16>
    %cst_30 = arith.constant dense<0.000000e+00> : vector<8x128xf32>
    %110 = tpu.matmul %109, %3, %cst_30 {dimension_numbers = #tpu.dot_dimension_numbers<[1], [0], [0], [1], [0, 0, 1, 1], [], []>} : vector<8x32xbf16>, vector<32x128xbf16>, vector<8x128xf32> -> vector<8x128xf32>
    %111 = arith.addf %108, %110 : vector<8x128xf32>
    %112 = arith.negf %111 : vector<8x128xf32>
    %113 = math.exp %112 : vector<8x128xf32>
    %cst_31 = arith.constant 1.000000e+00 : f32
    %114 = vector.broadcast %cst_31 : f32 to vector<8x128xf32>
    %115 = arith.addf %114, %113 : vector<8x128xf32>
    %116 = arith.divf %114, %115 : vector<8x128xf32>
    %117 = math.tanh %111 : vector<8x128xf32>
    %118 = tpu.iota {dimensions = array<i32: 1>} : vector<8x128xi32>
    %c64_i32_32 = arith.constant 64 : i32
    %119 = vector.broadcast %c64_i32_32 : i32 to vector<8x128xi32>
    %120 = arith.cmpi sge, %118, %119 : vector<8x128xi32>
    %c96_i32_33 = arith.constant 96 : i32
    %121 = vector.broadcast %c96_i32_33 : i32 to vector<8x128xi32>
    %122 = arith.cmpi slt, %118, %121 : vector<8x128xi32>
    %123 = arith.andi %120, %122 : vector<8x128xi1>
    %124 = arith.select %123, %117, %116 : vector<8x128xi1>, vector<8x128xf32>
    %125 = vector.extract_strided_slice %124 {offsets = [0, 0], sizes = [8, 32], strides = [1, 1]} : vector<8x128xf32> to vector<8x32xf32>
    %126 = vector.extract_strided_slice %124 {offsets = [0, 32], sizes = [8, 32], strides = [1, 1]} : vector<8x128xf32> to vector<8x32xf32>
    %127 = vector.extract_strided_slice %124 {offsets = [0, 64], sizes = [8, 32], strides = [1, 1]} : vector<8x128xf32> to vector<8x32xf32>
    %128 = vector.extract_strided_slice %124 {offsets = [0, 96], sizes = [8, 32], strides = [1, 1]} : vector<8x128xf32> to vector<8x32xf32>
    %129 = arith.mulf %126, %98 : vector<8x32xf32>
    %130 = arith.mulf %125, %127 : vector<8x32xf32>
    %131 = arith.addf %129, %130 : vector<8x32xf32>
    %132 = math.tanh %131 : vector<8x32xf32>
    %133 = arith.mulf %128, %132 : vector<8x32xf32>
    %134 = arith.index_cast %c3_i32 : i32 to index
    %c0_34 = arith.constant 0 : index
    %c0_35 = arith.constant 0 : index
    %135 = vector.load %arg13[%134, %c0_34, %c0_35] : memref<8x8x32xf32, #tpu.memory_space<vmem>>, vector<1x8x32xf32>
    %136 = vector.shape_cast %135 : vector<1x8x32xf32> to vector<8x32xf32>
    %137 = vector.shape_cast %133 : vector<8x32xf32> to vector<1x8x32xf32>
    tpu.vector_store %arg13[%134, %c0_34, %c0_35], %137 {strides = array<i32>} : memref<8x8x32xf32, #tpu.memory_space<vmem>>, vector<1x8x32xf32>,
    %c4_i32 = arith.constant 4 : i32
    %138 = arith.index_cast %c4_i32 : i32 to index
    %c0_36 = arith.constant 0 : index
    %c0_37 = arith.constant 0 : index
    %139 = vector.load %arg2[%138, %c0_36, %c0_37] : memref<8x8x128xbf16, #tpu.memory_space<vmem>>, vector<1x8x128xbf16>
    %140 = vector.shape_cast %139 : vector<1x8x128xbf16> to vector<8x128xbf16>
    %141 = arith.extf %140 : vector<8x128xbf16> to vector<8x128xf32>
    %142 = arith.truncf %133 : vector<8x32xf32> to vector<8x32xbf16>
    %cst_38 = arith.constant dense<0.000000e+00> : vector<8x128xf32>
    %143 = tpu.matmul %142, %3, %cst_38 {dimension_numbers = #tpu.dot_dimension_numbers<[1], [0], [0], [1], [0, 0, 1, 1], [], []>} : vector<8x32xbf16>, vector<32x128xbf16>, vector<8x128xf32> -> vector<8x128xf32>
    %144 = arith.addf %141, %143 : vector<8x128xf32>
    %145 = arith.negf %144 : vector<8x128xf32>
    %146 = math.exp %145 : vector<8x128xf32>
    %cst_39 = arith.constant 1.000000e+00 : f32
    %147 = vector.broadcast %cst_39 : f32 to vector<8x128xf32>
    %148 = arith.addf %147, %146 : vector<8x128xf32>
    %149 = arith.divf %147, %148 : vector<8x128xf32>
    %150 = math.tanh %144 : vector<8x128xf32>
    %151 = tpu.iota {dimensions = array<i32: 1>} : vector<8x128xi32>
    %c64_i32_40 = arith.constant 64 : i32
    %152 = vector.broadcast %c64_i32_40 : i32 to vector<8x128xi32>
    %153 = arith.cmpi sge, %151, %152 : vector<8x128xi32>
    %c96_i32_41 = arith.constant 96 : i32
    %154 = vector.broadcast %c96_i32_41 : i32 to vector<8x128xi32>
    %155 = arith.cmpi slt, %151, %154 : vector<8x128xi32>
    %156 = arith.andi %153, %155 : vector<8x128xi1>
    %157 = arith.select %156, %150, %149 : vector<8x128xi1>, vector<8x128xf32>
    %158 = vector.extract_strided_slice %157 {offsets = [0, 0], sizes = [8, 32], strides = [1, 1]} : vector<8x128xf32> to vector<8x32xf32>
    %159 = vector.extract_strided_slice %157 {offsets = [0, 32], sizes = [8, 32], strides = [1, 1]} : vector<8x128xf32> to vector<8x32xf32>
    %160 = vector.extract_strided_slice %157 {offsets = [0, 64], sizes = [8, 32], strides = [1, 1]} : vector<8x128xf32> to vector<8x32xf32>
    %161 = vector.extract_strided_slice %157 {offsets = [0, 96], sizes = [8, 32], strides = [1, 1]} : vector<8x128xf32> to vector<8x32xf32>
    %162 = arith.mulf %159, %131 : vector<8x32xf32>
    %163 = arith.mulf %158, %160 : vector<8x32xf32>
    %164 = arith.addf %162, %163 : vector<8x32xf32>
    %165 = math.tanh %164 : vector<8x32xf32>
    %166 = arith.mulf %161, %165 : vector<8x32xf32>
    %167 = arith.index_cast %c4_i32 : i32 to index
    %c0_42 = arith.constant 0 : index
    %c0_43 = arith.constant 0 : index
    %168 = vector.load %arg13[%167, %c0_42, %c0_43] : memref<8x8x32xf32, #tpu.memory_space<vmem>>, vector<1x8x32xf32>
    %169 = vector.shape_cast %168 : vector<1x8x32xf32> to vector<8x32xf32>
    %170 = vector.shape_cast %166 : vector<8x32xf32> to vector<1x8x32xf32>
    tpu.vector_store %arg13[%167, %c0_42, %c0_43], %170 {strides = array<i32>} : memref<8x8x32xf32, #tpu.memory_space<vmem>>, vector<1x8x32xf32>,
    %c5_i32 = arith.constant 5 : i32
    %171 = arith.index_cast %c5_i32 : i32 to index
    %c0_44 = arith.constant 0 : index
    %c0_45 = arith.constant 0 : index
    %172 = vector.load %arg2[%171, %c0_44, %c0_45] : memref<8x8x128xbf16, #tpu.memory_space<vmem>>, vector<1x8x128xbf16>
    %173 = vector.shape_cast %172 : vector<1x8x128xbf16> to vector<8x128xbf16>
    %174 = arith.extf %173 : vector<8x128xbf16> to vector<8x128xf32>
    %175 = arith.truncf %166 : vector<8x32xf32> to vector<8x32xbf16>
    %cst_46 = arith.constant dense<0.000000e+00> : vector<8x128xf32>
    %176 = tpu.matmul %175, %3, %cst_46 {dimension_numbers = #tpu.dot_dimension_numbers<[1], [0], [0], [1], [0, 0, 1, 1], [], []>} : vector<8x32xbf16>, vector<32x128xbf16>, vector<8x128xf32> -> vector<8x128xf32>
    %177 = arith.addf %174, %176 : vector<8x128xf32>
    %178 = arith.negf %177 : vector<8x128xf32>
    %179 = math.exp %178 : vector<8x128xf32>
    %cst_47 = arith.constant 1.000000e+00 : f32
    %180 = vector.broadcast %cst_47 : f32 to vector<8x128xf32>
    %181 = arith.addf %180, %179 : vector<8x128xf32>
    %182 = arith.divf %180, %181 : vector<8x128xf32>
    %183 = math.tanh %177 : vector<8x128xf32>
    %184 = tpu.iota {dimensions = array<i32: 1>} : vector<8x128xi32>
    %c64_i32_48 = arith.constant 64 : i32
    %185 = vector.broadcast %c64_i32_48 : i32 to vector<8x128xi32>
    %186 = arith.cmpi sge, %184, %185 : vector<8x128xi32>
    %c96_i32_49 = arith.constant 96 : i32
    %187 = vector.broadcast %c96_i32_49 : i32 to vector<8x128xi32>
    %188 = arith.cmpi slt, %184, %187 : vector<8x128xi32>
    %189 = arith.andi %186, %188 : vector<8x128xi1>
    %190 = arith.select %189, %183, %182 : vector<8x128xi1>, vector<8x128xf32>
    %191 = vector.extract_strided_slice %190 {offsets = [0, 0], sizes = [8, 32], strides = [1, 1]} : vector<8x128xf32> to vector<8x32xf32>
    %192 = vector.extract_strided_slice %190 {offsets = [0, 32], sizes = [8, 32], strides = [1, 1]} : vector<8x128xf32> to vector<8x32xf32>
    %193 = vector.extract_strided_slice %190 {offsets = [0, 64], sizes = [8, 32], strides = [1, 1]} : vector<8x128xf32> to vector<8x32xf32>
    %194 = vector.extract_strided_slice %190 {offsets = [0, 96], sizes = [8, 32], strides = [1, 1]} : vector<8x128xf32> to vector<8x32xf32>
    %195 = arith.mulf %192, %164 : vector<8x32xf32>
    %196 = arith.mulf %191, %193 : vector<8x32xf32>
    %197 = arith.addf %195, %196 : vector<8x32xf32>
    %198 = math.tanh %197 : vector<8x32xf32>
    %199 = arith.mulf %194, %198 : vector<8x32xf32>
    %200 = arith.index_cast %c5_i32 : i32 to index
    %c0_50 = arith.constant 0 : index
    %c0_51 = arith.constant 0 : index
    %201 = vector.load %arg13[%200, %c0_50, %c0_51] : memref<8x8x32xf32, #tpu.memory_space<vmem>>, vector<1x8x32xf32>
    %202 = vector.shape_cast %201 : vector<1x8x32xf32> to vector<8x32xf32>
    %203 = vector.shape_cast %199 : vector<8x32xf32> to vector<1x8x32xf32>
    tpu.vector_store %arg13[%200, %c0_50, %c0_51], %203 {strides = array<i32>} : memref<8x8x32xf32, #tpu.memory_space<vmem>>, vector<1x8x32xf32>,
    %c6_i32 = arith.constant 6 : i32
    %204 = arith.index_cast %c6_i32 : i32 to index
    %c0_52 = arith.constant 0 : index
    %c0_53 = arith.constant 0 : index
    %205 = vector.load %arg2[%204, %c0_52, %c0_53] : memref<8x8x128xbf16, #tpu.memory_space<vmem>>, vector<1x8x128xbf16>
    %206 = vector.shape_cast %205 : vector<1x8x128xbf16> to vector<8x128xbf16>
    %207 = arith.extf %206 : vector<8x128xbf16> to vector<8x128xf32>
    %208 = arith.truncf %199 : vector<8x32xf32> to vector<8x32xbf16>
    %cst_54 = arith.constant dense<0.000000e+00> : vector<8x128xf32>
    %209 = tpu.matmul %208, %3, %cst_54 {dimension_numbers = #tpu.dot_dimension_numbers<[1], [0], [0], [1], [0, 0, 1, 1], [], []>} : vector<8x32xbf16>, vector<32x128xbf16>, vector<8x128xf32> -> vector<8x128xf32>
    %210 = arith.addf %207, %209 : vector<8x128xf32>
    %211 = arith.negf %210 : vector<8x128xf32>
    %212 = math.exp %211 : vector<8x128xf32>
    %cst_55 = arith.constant 1.000000e+00 : f32
    %213 = vector.broadcast %cst_55 : f32 to vector<8x128xf32>
    %214 = arith.addf %213, %212 : vector<8x128xf32>
    %215 = arith.divf %213, %214 : vector<8x128xf32>
    %216 = math.tanh %210 : vector<8x128xf32>
    %217 = tpu.iota {dimensions = array<i32: 1>} : vector<8x128xi32>
    %c64_i32_56 = arith.constant 64 : i32
    %218 = vector.broadcast %c64_i32_56 : i32 to vector<8x128xi32>
    %219 = arith.cmpi sge, %217, %218 : vector<8x128xi32>
    %c96_i32_57 = arith.constant 96 : i32
    %220 = vector.broadcast %c96_i32_57 : i32 to vector<8x128xi32>
    %221 = arith.cmpi slt, %217, %220 : vector<8x128xi32>
    %222 = arith.andi %219, %221 : vector<8x128xi1>
    %223 = arith.select %222, %216, %215 : vector<8x128xi1>, vector<8x128xf32>
    %224 = vector.extract_strided_slice %223 {offsets = [0, 0], sizes = [8, 32], strides = [1, 1]} : vector<8x128xf32> to vector<8x32xf32>
    %225 = vector.extract_strided_slice %223 {offsets = [0, 32], sizes = [8, 32], strides = [1, 1]} : vector<8x128xf32> to vector<8x32xf32>
    %226 = vector.extract_strided_slice %223 {offsets = [0, 64], sizes = [8, 32], strides = [1, 1]} : vector<8x128xf32> to vector<8x32xf32>
    %227 = vector.extract_strided_slice %223 {offsets = [0, 96], sizes = [8, 32], strides = [1, 1]} : vector<8x128xf32> to vector<8x32xf32>
    %228 = arith.mulf %225, %197 : vector<8x32xf32>
    %229 = arith.mulf %224, %226 : vector<8x32xf32>
    %230 = arith.addf %228, %229 : vector<8x32xf32>
    %231 = math.tanh %230 : vector<8x32xf32>
    %232 = arith.mulf %227, %231 : vector<8x32xf32>
    %233 = arith.index_cast %c6_i32 : i32 to index
    %c0_58 = arith.constant 0 : index
    %c0_59 = arith.constant 0 : index
    %234 = vector.load %arg13[%233, %c0_58, %c0_59] : memref<8x8x32xf32, #tpu.memory_space<vmem>>, vector<1x8x32xf32>
    %235 = vector.shape_cast %234 : vector<1x8x32xf32> to vector<8x32xf32>
    %236 = vector.shape_cast %232 : vector<8x32xf32> to vector<1x8x32xf32>
    tpu.vector_store %arg13[%233, %c0_58, %c0_59], %236 {strides = array<i32>} : memref<8x8x32xf32, #tpu.memory_space<vmem>>, vector<1x8x32xf32>,
    %c7_i32 = arith.constant 7 : i32
    %237 = arith.index_cast %c7_i32 : i32 to index
    %c0_60 = arith.constant 0 : index
    %c0_61 = arith.constant 0 : index
    %238 = vector.load %arg2[%237, %c0_60, %c0_61] : memref<8x8x128xbf16, #tpu.memory_space<vmem>>, vector<1x8x128xbf16>
    %239 = vector.shape_cast %238 : vector<1x8x128xbf16> to vector<8x128xbf16>
    %240 = arith.extf %239 : vector<8x128xbf16> to vector<8x128xf32>
    %241 = arith.truncf %232 : vector<8x32xf32> to vector<8x32xbf16>
    %cst_62 = arith.constant dense<0.000000e+00> : vector<8x128xf32>
    %242 = tpu.matmul %241, %3, %cst_62 {dimension_numbers = #tpu.dot_dimension_numbers<[1], [0], [0], [1], [0, 0, 1, 1], [], []>} : vector<8x32xbf16>, vector<32x128xbf16>, vector<8x128xf32> -> vector<8x128xf32>
    %243 = arith.addf %240, %242 : vector<8x128xf32>
    %244 = arith.negf %243 : vector<8x128xf32>
    %245 = math.exp %244 : vector<8x128xf32>
    %cst_63 = arith.constant 1.000000e+00 : f32
    %246 = vector.broadcast %cst_63 : f32 to vector<8x128xf32>
    %247 = arith.addf %246, %245 : vector<8x128xf32>
    %248 = arith.divf %246, %247 : vector<8x128xf32>
    %249 = math.tanh %243 : vector<8x128xf32>
    %250 = tpu.iota {dimensions = array<i32: 1>} : vector<8x128xi32>
    %c64_i32_64 = arith.constant 64 : i32
    %251 = vector.broadcast %c64_i32_64 : i32 to vector<8x128xi32>
    %252 = arith.cmpi sge, %250, %251 : vector<8x128xi32>
    %c96_i32_65 = arith.constant 96 : i32
    %253 = vector.broadcast %c96_i32_65 : i32 to vector<8x128xi32>
    %254 = arith.cmpi slt, %250, %253 : vector<8x128xi32>
    %255 = arith.andi %252, %254 : vector<8x128xi1>
    %256 = arith.select %255, %249, %248 : vector<8x128xi1>, vector<8x128xf32>
    %257 = vector.extract_strided_slice %256 {offsets = [0, 0], sizes = [8, 32], strides = [1, 1]} : vector<8x128xf32> to vector<8x32xf32>
    %258 = vector.extract_strided_slice %256 {offsets = [0, 32], sizes = [8, 32], strides = [1, 1]} : vector<8x128xf32> to vector<8x32xf32>
    %259 = vector.extract_strided_slice %256 {offsets = [0, 64], sizes = [8, 32], strides = [1, 1]} : vector<8x128xf32> to vector<8x32xf32>
    %260 = vector.extract_strided_slice %256 {offsets = [0, 96], sizes = [8, 32], strides = [1, 1]} : vector<8x128xf32> to vector<8x32xf32>
    %261 = arith.mulf %258, %230 : vector<8x32xf32>
    %262 = arith.mulf %257, %259 : vector<8x32xf32>
    %263 = arith.addf %261, %262 : vector<8x32xf32>
    %264 = math.tanh %263 : vector<8x32xf32>
    %265 = arith.mulf %260, %264 : vector<8x32xf32>
    %266 = arith.index_cast %c7_i32 : i32 to index
    %c0_66 = arith.constant 0 : index
    %c0_67 = arith.constant 0 : index
    %267 = vector.load %arg13[%266, %c0_66, %c0_67] : memref<8x8x32xf32, #tpu.memory_space<vmem>>, vector<1x8x32xf32>
    %268 = vector.shape_cast %267 : vector<1x8x32xf32> to vector<8x32xf32>
    %269 = vector.shape_cast %265 : vector<8x32xf32> to vector<1x8x32xf32>
    tpu.vector_store %arg13[%266, %c0_66, %c0_67], %269 {strides = array<i32>} : memref<8x8x32xf32, #tpu.memory_space<vmem>>, vector<1x8x32xf32>,
    %c8_i32 = arith.constant 8 : i32
    %c0_68 = arith.constant 0 : index
    %c0_69 = arith.constant 0 : index
    %270 = vector.load %arg11[%c0_68, %c0_69] : memref<8x32xf32, #tpu.memory_space<vmem>>, vector<8x32xf32>
    tpu.vector_store %arg11[%c0_68, %c0_69], %265 {strides = array<i32>} : memref<8x32xf32, #tpu.memory_space<vmem>>, vector<8x32xf32>,
    %c0_70 = arith.constant 0 : index
    %c0_71 = arith.constant 0 : index
    %271 = vector.load %arg12[%c0_70, %c0_71] : memref<8x32xf32, #tpu.memory_space<vmem>>, vector<8x32xf32>
    tpu.vector_store %arg12[%c0_70, %c0_71], %263 {strides = array<i32>} : memref<8x32xf32, #tpu.memory_space<vmem>>, vector<8x32xf32>,
    %c0_72 = arith.constant 0 : index
    %c0_73 = arith.constant 0 : index
    %c0_74 = arith.constant 0 : index
    %272 = vector.load %arg13[%c0_72, %c0_73, %c0_74] : memref<8x8x32xf32, #tpu.memory_space<vmem>>, vector<8x8x32xf32>
    %273 = math.tanh %272 : vector<8x8x32xf32>
    %274 = vector.shape_cast %273 : vector<8x8x32xf32> to vector<64x32xf32>
    %275 = arith.truncf %274 : vector<64x32xf32> to vector<64x32xbf16>
    %c0_75 = arith.constant 0 : index
    %c0_76 = arith.constant 0 : index
    %276 = vector.load %arg6[%c0_75, %c0_76] : memref<32x4xbf16, #tpu.memory_space<vmem>>, vector<32x4xbf16>
    %cst_77 = arith.constant dense<0.000000e+00> : vector<64x4xf32>
    %277 = tpu.matmul %275, %276, %cst_77 {dimension_numbers = #tpu.dot_dimension_numbers<[1], [0], [0], [1], [0, 0, 1, 1], [], []>} : vector<64x32xbf16>, vector<32x4xbf16>, vector<64x4xf32> -> vector<64x4xf32>
    %c0_78 = arith.constant 0 : index
    %c0_79 = arith.constant 0 : index
    %278 = vector.load %arg7[%c0_78, %c0_79] : memref<1x4xf32, #tpu.memory_space<vmem>>, vector<1x4xf32>
    %279 = vector.broadcast %278 : vector<1x4xf32> to vector<64x4xf32>
    %280 = arith.addf %277, %279 : vector<64x4xf32>
    %281 = math.tanh %280 : vector<64x4xf32>
    %282 = vector.shape_cast %281 : vector<64x4xf32> to vector<8x8x4xf32>
    %c0_80 = arith.constant 0 : index
    %c0_81 = arith.constant 0 : index
    %c0_82 = arith.constant 0 : index
    %283 = vector.load %arg8[%c0_80, %c0_81, %c0_82] : memref<8x8x4xf32, #tpu.memory_space<vmem>>, vector<8x8x4xf32>
    tpu.vector_store %arg8[%c0_80, %c0_81, %c0_82], %282 {strides = array<i32>} : memref<8x8x4xf32, #tpu.memory_space<vmem>>, vector<8x8x4xf32>,
    %c0_i32_83 = arith.constant 0 : i32
    %284 = arith.cmpi eq, %arg1, %c0_i32_83 : i32
    %285 = arith.extui %284 : i1 to i32
    %c0_i32_84 = arith.constant 0 : i32
    %286 = arith.cmpi ne, %285, %c0_i32_84 : i32
    scf.if %286 {
      %c0_85 = arith.constant 0 : index
      %c0_86 = arith.constant 0 : index
      %287 = vector.load %arg9[%c0_85, %c0_86] : memref<8x32xf32, #tpu.memory_space<vmem>>, vector<8x32xf32>
      tpu.vector_store %arg9[%c0_85, %c0_86], %265 {strides = array<i32>} : memref<8x32xf32, #tpu.memory_space<vmem>>, vector<8x32xf32>,
      %c0_87 = arith.constant 0 : index
      %c0_88 = arith.constant 0 : index
      %288 = vector.load %arg10[%c0_87, %c0_88] : memref<8x32xf32, #tpu.memory_space<vmem>>, vector<8x32xf32>
      tpu.vector_store %arg10[%c0_87, %c0_88], %263 {strides = array<i32>} : memref<8x32xf32, #tpu.memory_space<vmem>>, vector<8x32xf32>,
    } else {
    }
    return
  }
  func.func @transform_0(%arg0: i32, %arg1: i32) -> (i32, i32, i32) {
    %c0_i32 = arith.constant 0 : i32
    %c0_i32_0 = arith.constant 0 : i32
    return %arg1, %arg0, %c0_i32 : i32, i32, i32
  }
  func.func @transform_1(%arg0: i32, %arg1: i32) -> (i32, i32) {
    %c0_i32 = arith.constant 0 : i32
    %c0_i32_0 = arith.constant 0 : i32
    %c0_i32_1 = arith.constant 0 : i32
    return %c0_i32, %c0_i32_0 : i32, i32
  }
  func.func @transform_2(%arg0: i32, %arg1: i32) -> (i32, i32) {
    %c0_i32 = arith.constant 0 : i32
    %c0_i32_0 = arith.constant 0 : i32
    return %arg0, %c0_i32 : i32, i32
  }
  func.func @transform_3(%arg0: i32, %arg1: i32) -> (i32, i32) {
    %c0_i32 = arith.constant 0 : i32
    %c0_i32_0 = arith.constant 0 : i32
    return %arg0, %c0_i32 : i32, i32
  }
  func.func @transform_4(%arg0: i32, %arg1: i32) -> (i32, i32) {
    %c0_i32 = arith.constant 0 : i32
    %c0_i32_0 = arith.constant 0 : i32
    %c0_i32_1 = arith.constant 0 : i32
    return %c0_i32, %c0_i32_0 : i32, i32
  }
  func.func @transform_5(%arg0: i32, %arg1: i32) -> (i32, i32) {
    %c0_i32 = arith.constant 0 : i32
    %c0_i32_0 = arith.constant 0 : i32
    %c0_i32_1 = arith.constant 0 : i32
    return %c0_i32, %c0_i32_0 : i32, i32
  }
  func.func @transform_6(%arg0: i32, %arg1: i32) -> (i32, i32, i32) {
    %c0_i32 = arith.constant 0 : i32
    %c0_i32_0 = arith.constant 0 : i32
    return %arg1, %arg0, %c0_i32 : i32, i32, i32
  }
  func.func @transform_7(%arg0: i32, %arg1: i32) -> (i32, i32) {
    %c0_i32 = arith.constant 0 : i32
    %c0_i32_0 = arith.constant 0 : i32
    return %arg0, %c0_i32 : i32, i32
  }
  func.func @transform_8(%arg0: i32, %arg1: i32) -> (i32, i32) {
    %c0_i32 = arith.constant 0 : i32
    %c0_i32_0 = arith.constant 0 : i32
    return %arg0, %c0_i32 : i32, i32
  }
}

</mosaic_0001>

<bundles_post_ra>
// kernel: lstm_model_forward.6
= control target key start
LH: loop header
LB: loop body
LE: loop exit
PB: predicated region body
PF: predicated region fallthrough
CT: control target
= control target key end

     0   :  { %vm66_vm0 = vcmask 261120   ;;  %s319_s1 = inlined_call_operand.vmem [shape: bf16[32,128], index: 1, kind: input, shape index: {}]   ;;  %s320_s0 = inlined_call_operand.vmem [shape: bf16[64,32], index: 0, kind: input, shape index: {}]   ;;  %s321_s2 = inlined_call_operand.vmem [shape: f32[1,128], index: 2, kind: input, shape index: {}]   ;;  %s322_s3 = inlined_call_operand.vmem [shape: bf16[64,128], index: 3, kind: output, shape index: {}]  }
   0x1   :  { %v260_v0 = vld [vmem:[%s319_s1] sm:$0xff]   ;;  %v261_v1 = vld [vmem:[%s319_s1 + $0x8] sm:$0xff]   ;;  %v263_v3 = vld [vmem:[%s320_s0 + $0x10] sm:$0xff]  }
   0x2   :  { %244 = vmatprep.subr.bf16.mxu0 %v260_v0  ;;  %256 = vmatprep.subr.bf16.mxu1 %v260_v0  ;;  %v262_v2 = vld [vmem:[%s320_s0] sm:$0xff]   ;;  %v264_v4 = vld [vmem:[%s320_s0 + $0x8] sm:$0xff]   ;;  %v265_v5 = vld [vmem:[%s320_s0 + $0x18] sm:$0xff]  }
   0x3   :  { %245 = vmatpush3.bf16.msra.mxu0 %v260_v0  ;;  %258 = vmatpush3.bf16.msra.mxu1 %v260_v0  ;;  %v188_v7 = vld [vmem:[%s321_s2] ss:$0 sm:$0xff] }
   0x4   :  { %246 = vmatprep.subr.bf16.mxu0 %v261_v1  ;;  %257 = vmatprep.subr.bf16.mxu1 %v261_v1 }
   0x5   :  { %248 = vmatprep.mubr.msk.bf16.mxu0 %vm66_vm0, %v262_v2  ;;  %252 = vmatprep.mubr.msk.bf16.mxu1 %vm66_vm0, %v263_v3 }
   0x7   :  { %247 = vmatpush3.bf16.msra.mxu0 %v261_v1  ;;  %259 = vmatpush3.bf16.msra.mxu1 %v261_v1 }
   0xa   :  { %249 = vmatmul.mubr.msk.bf16.vlgmr.msra.gmra.mrb[0].mxu0 %vm66_vm0, %v264_v4  ;;  %253 = vmatmul.mubr.msk.bf16.vlgmr.msra.gmra.mrb[0].mxu1 %vm66_vm0, %v265_v5 }
  0xdd   :  { %v250_v6 = vpop.f32.mrb[0].mxu0  ;;  %v254_v8 = vpop.f32.mrb[0].mxu1 }
  0xde   :  { %v113_v9 = vpop.f32.mrb[1].mxu0  ;;  %v129_v10 = vpop.f32.mrb[1].mxu1  ;;  %v122_v13 = vadd.f32 %v250_v6, %v188_v7  ;;  %v138_v14 = vadd.f32 %v254_v8, %v188_v7 }
  0xdf   :  { %v251_v11 = vpop.f32.mrb[2].mxu0  ;;  %v255_v12 = vpop.f32.mrb[2].mxu1  ;;  %v114_v19 = vadd.f32 %v188_v7, %v113_v9  ;;  %v130_v20 = vadd.f32 %v188_v7, %v129_v10 }
  0xe0   :  { %v125_v15 = vadd.f32 %v251_v11, %v188_v7  ;;  %v141_v16 = vadd.f32 %v255_v12, %v188_v7  ;;  %v116_v17 = vpop.f32.mrb[3].mxu0  ;;  %v132_v18 = vpop.f32.mrb[3].mxu1 }
  0xe1   :  { %v117_v21 = vadd.f32 %v188_v7, %v116_v17  ;;  %v133_v22 = vadd.f32 %v188_v7, %v132_v18 }
  0xe2   :  { %v223_v23 = vpack.c.bf16 %v125_v15, %v122_v13  ;;  %v233_v24 = vpack.c.bf16 %v141_v16, %v138_v14 }
  0xe3   :  { %v218_v25 = vpack.c.bf16 %v117_v21, %v114_v19  ;;  %v228_v26 = vpack.c.bf16 %v133_v22, %v130_v20 }
  0xe4   :  { %235 = vst [vmem:[%s322_s3 + $0x8] sm:$0xff] %v223_v23   ;;  %237 = vst [vmem:[%s322_s3 + $0x18] sm:$0xff] %v233_v24  }
  0xe5   :  { %219 = vst [vmem:[%s322_s3] sm:$0xff] %v218_v25   ;;  %236 = vst [vmem:[%s322_s3 + $0x10] sm:$0xff] %v228_v26  }

// kernel: lstm_model_forward.4
= control target key start
LH: loop header
LB: loop body
LE: loop exit
PB: predicated region body
PF: predicated region fallthrough
CT: control target
= control target key end

     0   :  { %vm64_vm0 = vcmask 1041408   ;;  %vm51_vm1 = vcmask 31744   ;;  %s298_s1 = inlined_call_operand.vmem [shape: bf16[4,128], index: 1, kind: input, shape index: {}]   ;;  %s299_s0 = inlined_call_operand.vmem [shape: bf16[64,4], index: 0, kind: input, shape index: {}]   ;;  %s300_s2 = inlined_call_operand.vmem [shape: f32[1,128], index: 2, kind: input, shape index: {}]   ;;  %s301_s3 = inlined_call_operand.vmem [shape: bf16[64,128], index: 3, kind: output, shape index: {}]  }
   0x1   :  { %v23_v0 = vld [vmem:[%s298_s1] sm:$0x3]  ;;  %v245_v3 = vld [vmem:[%s299_s0 + $0x10] sm:$0xff]   ;;  %v246_v4 = vld [vmem:[%s299_s0 + $0x8] sm:$0xff]  }
   0x2   :  { %242 = vmatprep.subr.msk.bf16.mxu0 %vm64_vm0, %v23_v0  ;;  %243 = vmatprep.subr.msk.bf16.mxu1 %vm64_vm0, %v23_v0  ;;  %v66_v1 = vsel %vm64_vm0, %v23_v0, 0  ;;  %v244_v2 = vld [vmem:[%s299_s0] sm:$0xff]   ;;  %v247_v5 = vld [vmem:[%s299_s0 + $0x18] sm:$0xff]  }
   0x3   :  { %231 = vmatpush3.bf16.msra.mxu0 %v66_v1  ;;  %241 = vmatpush3.bf16.msra.mxu1 %v66_v1  ;;  %v177_v7 = vld [vmem:[%s300_s2] ss:$0 sm:$0xff] }
   0x4   :  { %232 = vmatprep.mubr.msk.bf16.mxu0 %vm51_vm1, %v244_v2  ;;  %236 = vmatprep.mubr.msk.bf16.mxu1 %vm51_vm1, %v245_v3 }
   0x6   :  { %233 = vmatmul.mubr.msk.bf16.vlgmr.msra.gmra.mrb[0].mxu0 %vm51_vm1, %v246_v4  ;;  %237 = vmatmul.mubr.msk.bf16.vlgmr.msra.gmra.mrb[0].mxu1 %vm51_vm1, %v247_v5 }
  0xd9   :  { %v234_v6 = vpop.f32.mrb[0].mxu0  ;;  %v238_v8 = vpop.f32.mrb[0].mxu1 }
  0xda   :  { %v102_v9 = vpop.f32.mrb[1].mxu0  ;;  %v118_v10 = vpop.f32.mrb[1].mxu1  ;;  %v111_v12 = vadd.f32 %v234_v6, %v177_v7  ;;  %v127_v16 = vadd.f32 %v238_v8, %v177_v7 }
  0xdb   :  { %v235_v11 = vpop.f32.mrb[2].mxu0  ;;  %v239_v14 = vpop.f32.mrb[2].mxu1  ;;  %v103_v17 = vadd.f32 %v177_v7, %v102_v9  ;;  %v119_v21 = vadd.f32 %v177_v7, %v118_v10 }
  0xdc   :  { %v114_v13 = vadd.f32 %v235_v11, %v177_v7  ;;  %v105_v15 = vpop.f32.mrb[3].mxu0  ;;  %v130_v18 = vadd.f32 %v239_v14, %v177_v7  ;;  %v121_v20 = vpop.f32.mrb[3].mxu1 }
  0xdd   :  { %v106_v19 = vadd.f32 %v177_v7, %v105_v15  ;;  %v122_v23 = vadd.f32 %v177_v7, %v121_v20 }
  0xde   :  { %v210_v22 = vpack.c.bf16 %v114_v13, %v111_v12  ;;  %v220_v24 = vpack.c.bf16 %v130_v18, %v127_v16 }
  0xdf   :  { %v205_v25 = vpack.c.bf16 %v106_v19, %v103_v17  ;;  %v215_v26 = vpack.c.bf16 %v122_v23, %v119_v21 }
  0xe0   :  { %222 = vst [vmem:[%s301_s3 + $0x8] sm:$0xff] %v210_v22   ;;  %224 = vst [vmem:[%s301_s3 + $0x18] sm:$0xff] %v220_v24  }
  0xe1   :  { %206 = vst [vmem:[%s301_s3] sm:$0xff] %v205_v25   ;;  %223 = vst [vmem:[%s301_s3 + $0x10] sm:$0xff] %v215_v26  }

// kernel: lstm_model_forward.5
= control target key start
LH: loop header
LB: loop body
LE: loop exit
PB: predicated region body
PF: predicated region fallthrough
CT: control target
= control target key end

     0   :  { %v954_v0 = vmov 0.0   ;;  %vm955_vm0 = vmmov 0   ;;  %vm26_vm1 = vcmask 261120   ;;  %v103_v16 = vlaneseq  ;;  %s957_s29 = smov 32   ;;  %s958_s25 = smov 96   ;;  %s1210_s1 = inlined_call_operand.vmem [shape: bf16[32,128], index: 1, kind: input, shape index: {}]   ;;  %s1211_s2 = inlined_call_operand.vmem [shape: f32[8,32], index: 2, kind: input, shape index: {}]   ;;  %s1212_s3 = inlined_call_operand.vmem [shape: f32[8,32], index: 3, kind: input, shape index: {}]   ;;  %s1213_s0 = inlined_call_operand.vmem [shape: bf16[8,8,128], index: 0, kind: input, shape index: {}]   ;;  %s1214_s4 = inlined_call_operand.vmem [shape: bf16[8,8,32], index: 4, kind: output, shape index: {0}]   ;;  %s1215_s5 = inlined_call_operand.vmem [shape: f32[8,32], index: 5, kind: output, shape index: {1}]   ;;  %s1216_s6 = inlined_call_operand.vmem [shape: f32[8,32], index: 6, kind: output, shape index: {2}]  }
   0x1   :  { %819 = vmatprep.subr.bf16.mxu0 %v954_v0  ;;  %v998_v1 = vld [vmem:[%s1210_s1] sm:$0xff]   ;;  %823 = vmatprep.mubr.msk.bf16.mxu0 %vm955_vm0, %v954_v0  ;;  %v1009_v2 = vld [vmem:[%s1210_s1 + $0x8] sm:$0xff]   ;;  %vm137_vm5 = vcmask 257024  }
   0x2   :  { %827 = vmatprep.subr.bf16.mxu1 %v954_v0  ;;  %831 = vmatprep.mubr.msk.bf16.mxu1 %vm955_vm0, %v954_v0  ;;  %v25_v3 = vld [vmem:[%s1211_s2] sm:$0xff]  ;;  %v104_v18 = vand.u32 127, %v103_v16 }
   0x3   :  { %820 = vmatpush3.bf16.msra.mxu0 %v998_v1  ;;  %828 = vmatpush3.bf16.msra.mxu1 %v998_v1  ;;  %27 = vst.msk [vmem:[#allocation2] sm:$0xff] %vm26_vm1, %v25_v3  ;;  %v28_v6 = vld [vmem:[%s1212_s3] sm:$0xff]  ;;  %s956_s3 = smov 64  }
   0x4   :  { %821 = vmatprep.subr.bf16.mxu0 %v954_v0  ;;  %829 = vmatprep.subr.bf16.mxu1 %v954_v0  ;;  %29 = vst.msk [vmem:[#allocation3] sm:$0xff] %vm26_vm1, %v28_v6  ;;  %v36_v7 = vld [vmem:[%s1213_s0] sm:$0xf]  ;;  %vm105_vm2 = vcmp.ge.s32.totalorder %v104_v18, 64  ;;  %vm106_vm3 = vcmp.lt.s32.totalorder %v104_v18, 96  ;;  %v752_v35 = vld [vmem:[%s1213_s0 + $0x4] sm:$0xff]  }
   0x5   :  { %v37_v8 = vunpack.c.l.bf16 %v36_v7  ;;  %vm1036_vm4 = vmand %vm105_vm2, %vm106_vm3  ;;  %v141_v36 = vunpack.c.l.bf16 %v752_v35  ;;  %v224_v58 = vunpack.c.h.bf16 %v752_v35 }
   0x7   :  { %822 = vmatpush3.bf16.msra.mxu0 %v1009_v2  ;;  %830 = vmatpush3.bf16.msra.mxu1 %v1009_v2 }
   0x8   :  { %835 = vmatprep.subr.bf16.mxu0 %v954_v0  ;;  %843 = vmatprep.subr.bf16.mxu1 %v954_v0 }
   0xa   :  { %v34_v4 = vld [vmem:[#allocation2] sm:$0xff] }
   0xb   :  { %v38_v5 = vpack.c.bf16 %v34_v4, %v34_v4  ;;  %v35_v23 = vld [vmem:[#allocation3] sm:$0xff] }
   0xd   :  { %824 = vmatmul.mubr.msk.bf16.vlgmr.msra.gmra.mrb[0].mxu0 %vm26_vm1, %v38_v5 }
   0xe   :  { %836 = vmatpush3.bf16.msra.mxu0 %v998_v1  ;;  %839 = vmatprep.mubr.msk.bf16.mxu0 %vm955_vm0, %v954_v0 }
   0xf   :  { %837 = vmatprep.subr.bf16.mxu0 %v954_v0 }
  0x12   :  { %838 = vmatpush3.bf16.msra.mxu0 %v1009_v2 }
  0x13   :  { %851 = vmatprep.subr.bf16.mxu0 %v954_v0 }
  0xe0   :  { %v89_v9 = vpop.f32.mrb[0].mxu0 }
  0xe1   :  { %v95_v10 = vadd.f32 %v89_v9, %v37_v8  ;;  %v825_v11 = vpop.f32.mrb[1].mxu0 }
  0xe2   :  { %v92_v12 = vpop.f32.mrb[2].mxu0 }
  0xe3   :  { %v750_v13 = vmul.f32 -1.442695, %v95_v10  ;;  %v826_v14 = vpop.f32.mrb[3].mxu0 }
  0xe5   :  { %890 = vpow2.f32 %v750_v13 }
  0xe6   :  { %892 = vtanh.f32 %v95_v10 }
  0xef   :  { %v891_v15 = vpop.eup %890 }
  0xf0   :  { %v99_v17 = vadd.f32 1.0, %v891_v15  ;;  %v893_v20 = vpop.eup %892 }
  0xf2   :  { %894 = vrcp.f32 %v99_v17 }
  0xfc   :  { %v895_v21 = vpop.eup %894 }
  0xfd   :  { %v108_v22 = vsel %vm1036_vm4, %v893_v20, %v895_v21  ;;  %v762_v20 = vld [vmem:[%s1213_s0 + $0xc] sm:$0xff]  }
  0xfe   :  { %115 = vrot.lane.b32.xlu0 %v108_v22, %s956_s3  ;;  %v307_v21 = vunpack.c.l.bf16 %v762_v20 }
 0x102   :  { %110 = vrot.lane.b32.xlu0 %v35_v23, %s957_s29 }
 0x170   :  { %v116_v24 = vpop.permute.xlu0 %115 }
 0x171   :  { %v118_v25 = vmul.f32 %v116_v24, %v108_v22 }
 0x173   :  { %120 = vrot.lane.b32.xlu1 %v118_v25, %s957_s29 }
 0x174   :  { %v111_v26 = vpop.permute.xlu0 %110 }
 0x175   :  { %v113_v27 = vmul.f32 %v111_v26, %v108_v22 }
 0x1e5   :  { %v121_v28 = vpop.permute.xlu1 %120 }
 0x1e6   :  { %v123_v29 = vadd.f32 %v121_v28, %v113_v27 }
 0x1e8   :  { %896 = vtanh.f32 %v123_v29 }
 0x1f2   :  { %v897_v30 = vpop.eup %896 }
 0x1f3   :  { %126 = vrot.lane.b32.xlu1 %v897_v30, %s956_s3 }
 0x265   :  { %v127_v31 = vpop.permute.xlu1 %126 }
 0x266   :  { %v129_v32 = vmul.f32 %v127_v31, %v108_v22 }
 0x268   :  { %v1046_v33 = vpack.c.bf16 %v129_v32, %v129_v32 }
 0x26a   :  { %142 = vrot.lane.b32.xlu0 %v1046_v33, %s957_s29 }
 0x2dc   :  { %v143_v34 = vpop.permute.xlu0 %142 }
 0x2dd   :  { %832 = vmatmul.mubr.msk.bf16.vlgmr.msra.gmra.mrb[0].mxu1 %vm26_vm1, %v143_v34 }
 0x2de   :  { %844 = vmatpush3.bf16.msra.mxu1 %v998_v1  ;;  %847 = vmatprep.mubr.msk.bf16.mxu1 %vm955_vm0, %v954_v0 }
 0x2df   :  { %845 = vmatprep.subr.bf16.mxu1 %v954_v0 }
 0x2e2   :  { %846 = vmatpush3.bf16.msra.mxu1 %v1009_v2 }
 0x2e3   :  { %859 = vmatprep.subr.bf16.mxu1 %v954_v0 }
 0x3b0   :  { %v181_v37 = vpop.f32.mrb[0].mxu1 }
 0x3b1   :  { %v187_v38 = vadd.f32 %v181_v37, %v141_v36  ;;  %v833_v39 = vpop.f32.mrb[1].mxu1 }
 0x3b2   :  { %v184_v40 = vpop.f32.mrb[2].mxu1 }
 0x3b3   :  { %v754_v41 = vmul.f32 -1.442695, %v187_v38  ;;  %v834_v42 = vpop.f32.mrb[3].mxu1 }
 0x3b5   :  { %898 = vpow2.f32 %v754_v41 }
 0x3b6   :  { %900 = vtanh.f32 %v187_v38 }
 0x3bf   :  { %v899_v43 = vpop.eup %898 }
 0x3c0   :  { %v191_v44 = vadd.f32 1.0, %v899_v43  ;;  %v901_v45 = vpop.eup %900 }
 0x3c2   :  { %902 = vrcp.f32 %v191_v44  ;;  %v390_v44 = vunpack.c.h.bf16 %v762_v20 }
 0x3cc   :  { %v903_v46 = vpop.eup %902 }
 0x3cd   :  { %v195_v47 = vsel %vm1036_vm4, %v901_v45, %v903_v46 }
 0x3ce   :  { %198 = vrot.lane.b32.xlu1 %v195_v47, %s956_s3  ;;  %v196_v50 = vmul.f32 %v195_v47, %v123_v29 }
 0x440   :  { %v199_v48 = vpop.permute.xlu1 %198 }
 0x441   :  { %v201_v49 = vmul.f32 %v199_v48, %v195_v47 }
 0x443   :  { %203 = vrot.lane.b32.xlu0 %v201_v49, %s957_s29 }
 0x4b5   :  { %v204_v51 = vpop.permute.xlu0 %203 }
 0x4b6   :  { %v206_v52 = vadd.f32 %v204_v51, %v196_v50 }
 0x4b8   :  { %904 = vtanh.f32 %v206_v52 }
 0x4c2   :  { %v905_v53 = vpop.eup %904 }
 0x4c3   :  { %209 = vrot.lane.b32.xlu1 %v905_v53, %s956_s3 }
 0x535   :  { %v210_v54 = vpop.permute.xlu1 %209 }
 0x536   :  { %v212_v55 = vmul.f32 %v210_v54, %v195_v47 }
 0x538   :  { %v1065_v56 = vpack.c.bf16 %v212_v55, %v212_v55 }
 0x53a   :  { %225 = vrot.lane.b32.xlu0 %v1065_v56, %s957_s29 }
 0x5ac   :  { %v226_v57 = vpop.permute.xlu0 %225 }
 0x5ad   :  { %840 = vmatmul.mubr.msk.bf16.vlgmr.msra.gmra.mrb[4].mxu0 %vm26_vm1, %v226_v57 }
 0x5ae   :  { %852 = vmatpush3.bf16.msra.mxu0 %v998_v1  ;;  %855 = vmatprep.mubr.msk.bf16.mxu0 %vm955_vm0, %v954_v0 }
 0x5af   :  { %853 = vmatprep.subr.bf16.mxu0 %v954_v0 }
 0x5b2   :  { %854 = vmatpush3.bf16.msra.mxu0 %v1009_v2 }
 0x5b3   :  { %867 = vmatprep.subr.bf16.mxu0 %v954_v0 }
 0x680   :  { %v264_v59 = vpop.f32.mrb[4].mxu0 }
 0x681   :  { %v270_v60 = vadd.f32 %v264_v59, %v224_v58  ;;  %v841_v61 = vpop.f32.mrb[5].mxu0 }
 0x682   :  { %v267_v62 = vpop.f32.mrb[6].mxu0 }
 0x683   :  { %v759_v63 = vmul.f32 -1.442695, %v270_v60  ;;  %v842_v3 = vpop.f32.mrb[7].mxu0 }
 0x685   :  { %906 = vpow2.f32 %v759_v63 }
 0x686   :  { %908 = vtanh.f32 %v270_v60 }
 0x68f   :  { %v907_v4 = vpop.eup %906 }
 0x690   :  { %v274_v5 = vadd.f32 1.0, %v907_v4  ;;  %v909_v6 = vpop.eup %908 }
 0x692   :  { %910 = vrcp.f32 %v274_v5 }
 0x69c   :  { %v911_v7 = vpop.eup %910 }
 0x69d   :  { %v278_v8 = vsel %vm1036_vm4, %v909_v6, %v911_v7  ;;  %v772_v6 = vld [vmem:[%s1213_s0 + $0x14] sm:$0xff]  }
 0x69e   :  { %281 = vrot.lane.b32.xlu1 %v278_v8, %s956_s3  ;;  %v279_v11 = vmul.f32 %v278_v8, %v206_v52  ;;  %v473_v7 = vunpack.c.l.bf16 %v772_v6 }
 0x710   :  { %v282_v9 = vpop.permute.xlu1 %281 }
 0x711   :  { %v284_v10 = vmul.f32 %v282_v9, %v278_v8 }
 0x713   :  { %286 = vrot.lane.b32.xlu0 %v284_v10, %s957_s29 }
 0x785   :  { %v287_v12 = vpop.permute.xlu0 %286 }
 0x786   :  { %v289_v13 = vadd.f32 %v287_v12, %v279_v11 }
 0x788   :  { %912 = vtanh.f32 %v289_v13 }
 0x792   :  { %v913_v14 = vpop.eup %912 }
 0x793   :  { %292 = vrot.lane.b32.xlu1 %v913_v14, %s956_s3 }
 0x805   :  { %v293_v15 = vpop.permute.xlu1 %292 }
 0x806   :  { %v295_v16 = vmul.f32 %v293_v15, %v278_v8 }
 0x808   :  { %v1081_v17 = vpack.c.bf16 %v295_v16, %v295_v16 }
 0x80a   :  { %308 = vrot.lane.b32.xlu0 %v1081_v17, %s957_s29 }
 0x87c   :  { %v309_v18 = vpop.permute.xlu0 %308 }
 0x87d   :  { %848 = vmatmul.mubr.msk.bf16.vlgmr.msra.gmra.mrb[4].mxu1 %vm26_vm1, %v309_v18 }
 0x87e   :  { %860 = vmatpush3.bf16.msra.mxu1 %v998_v1  ;;  %863 = vmatprep.mubr.msk.bf16.mxu1 %vm955_vm0, %v954_v0 }
 0x87f   :  { %861 = vmatprep.subr.bf16.mxu1 %v954_v0 }
 0x882   :  { %862 = vmatpush3.bf16.msra.mxu1 %v1009_v2 }
 0x883   :  { %875 = vmatprep.subr.bf16.mxu1 %v954_v0 }
 0x950   :  { %v347_v22 = vpop.f32.mrb[4].mxu1 }
 0x951   :  { %v353_v23 = vadd.f32 %v347_v22, %v307_v21  ;;  %v849_v24 = vpop.f32.mrb[5].mxu1 }
 0x952   :  { %v350_v25 = vpop.f32.mrb[6].mxu1 }
 0x953   :  { %v764_v26 = vmul.f32 -1.442695, %v353_v23  ;;  %v850_v27 = vpop.f32.mrb[7].mxu1 }
 0x955   :  { %914 = vpow2.f32 %v764_v26 }
 0x956   :  { %916 = vtanh.f32 %v353_v23 }
 0x95f   :  { %v915_v28 = vpop.eup %914 }
 0x960   :  { %v357_v29 = vadd.f32 1.0, %v915_v28  ;;  %v917_v30 = vpop.eup %916  ;;  %v556_v28 = vunpack.c.h.bf16 %v772_v6 }
 0x962   :  { %918 = vrcp.f32 %v357_v29 }
 0x96c   :  { %v919_v31 = vpop.eup %918 }
 0x96d   :  { %v361_v32 = vsel %vm1036_vm4, %v917_v30, %v919_v31 }
 0x96e   :  { %364 = vrot.lane.b32.xlu1 %v361_v32, %s956_s3  ;;  %v362_v36 = vmul.f32 %v361_v32, %v289_v13 }
 0x9e0   :  { %v365_v34 = vpop.permute.xlu1 %364 }
 0x9e1   :  { %v367_v35 = vmul.f32 %v365_v34, %v361_v32 }
 0x9e3   :  { %369 = vrot.lane.b32.xlu0 %v367_v35, %s957_s29 }
 0xa55   :  { %v370_v37 = vpop.permute.xlu0 %369 }
 0xa56   :  { %v372_v38 = vadd.f32 %v370_v37, %v362_v36 }
 0xa58   :  { %920 = vtanh.f32 %v372_v38 }
 0xa62   :  { %v921_v39 = vpop.eup %920 }
 0xa63   :  { %375 = vrot.lane.b32.xlu1 %v921_v39, %s956_s3 }
 0xad5   :  { %v376_v40 = vpop.permute.xlu1 %375 }
 0xad6   :  { %v378_v41 = vmul.f32 %v376_v40, %v361_v32 }
 0xad8   :  { %v1100_v42 = vpack.c.bf16 %v378_v41, %v378_v41 }
 0xada   :  { %391 = vrot.lane.b32.xlu0 %v1100_v42, %s957_s29 }
 0xb4c   :  { %v392_v43 = vpop.permute.xlu0 %391 }
 0xb4d   :  { %856 = vmatmul.mubr.msk.bf16.vlgmr.msra.gmra.mrb[8].mxu0 %vm26_vm1, %v392_v43 }
 0xb4e   :  { %868 = vmatpush3.bf16.msra.mxu0 %v998_v1  ;;  %871 = vmatprep.mubr.msk.bf16.mxu0 %vm955_vm0, %v954_v0 }
 0xb4f   :  { %869 = vmatprep.subr.bf16.mxu0 %v954_v0 }
 0xb52   :  { %870 = vmatpush3.bf16.msra.mxu0 %v1009_v2 }
 0xc20   :  { %v430_v45 = vpop.f32.mrb[8].mxu0 }
 0xc21   :  { %v436_v46 = vadd.f32 %v430_v45, %v390_v44  ;;  %v857_v47 = vpop.f32.mrb[9].mxu0 }
 0xc22   :  { %v433_v48 = vpop.f32.mrb[10].mxu0 }
 0xc23   :  { %v769_v49 = vmul.f32 -1.442695, %v436_v46  ;;  %v858_v50 = vpop.f32.mrb[11].mxu0 }
 0xc25   :  { %922 = vpow2.f32 %v769_v49 }
 0xc26   :  { %924 = vtanh.f32 %v436_v46 }
 0xc2f   :  { %v923_v51 = vpop.eup %922 }
 0xc30   :  { %v440_v52 = vadd.f32 1.0, %v923_v51  ;;  %v925_v53 = vpop.eup %924 }
 0xc32   :  { %926 = vrcp.f32 %v440_v52  ;;  %v782_v52 = vld [vmem:[%s1213_s0 + $0x1c] sm:$0xf] }
 0xc3c   :  { %v927_v54 = vpop.eup %926 }
 0xc3d   :  { %v444_v55 = vsel %vm1036_vm4, %v925_v53, %v927_v54  ;;  %v639_v53 = vunpack.c.l.bf16 %v782_v52 }
 0xc3e   :  { %447 = vrot.lane.b32.xlu1 %v444_v55, %s956_s3  ;;  %v445_v59 = vmul.f32 %v444_v55, %v372_v38 }
 0xcb0   :  { %v448_v57 = vpop.permute.xlu1 %447 }
 0xcb1   :  { %v450_v58 = vmul.f32 %v448_v57, %v444_v55 }
 0xcb3   :  { %452 = vrot.lane.b32.xlu0 %v450_v58, %s957_s29 }
 0xd25   :  { %v453_v60 = vpop.permute.xlu0 %452 }
 0xd26   :  { %v455_v61 = vadd.f32 %v453_v60, %v445_v59 }
 0xd28   :  { %928 = vtanh.f32 %v455_v61 }
 0xd32   :  { %v929_v62 = vpop.eup %928 }
 0xd33   :  { %458 = vrot.lane.b32.xlu1 %v929_v62, %s956_s3 }
 0xda5   :  { %v459_v63 = vpop.permute.xlu1 %458 }
 0xda6   :  { %v461_v3 = vmul.f32 %v459_v63, %v444_v55 }
 0xda8   :  { %v1115_v4 = vpack.c.bf16 %v461_v3, %v461_v3 }
 0xdaa   :  { %474 = vrot.lane.b32.xlu0 %v1115_v4, %s957_s29 }
 0xe1c   :  { %v475_v5 = vpop.permute.xlu0 %474 }
 0xe1d   :  { %864 = vmatmul.mubr.msk.bf16.vlgmr.msra.gmra.mrb[8].mxu1 %vm26_vm1, %v475_v5 }
 0xe1e   :  { %876 = vmatpush3.bf16.msra.mxu1 %v998_v1  ;;  %879 = vmatprep.mubr.msk.bf16.mxu1 %vm955_vm0, %v954_v0 }
 0xe1f   :  { %877 = vmatprep.subr.bf16.mxu1 %v954_v0 }
 0xe22   :  { %878 = vmatpush3.bf16.msra.mxu1 %v1009_v2 }
 0xef0   :  { %v513_v8 = vpop.f32.mrb[8].mxu1 }
 0xef1   :  { %v519_v9 = vadd.f32 %v513_v8, %v473_v7  ;;  %v865_v10 = vpop.f32.mrb[9].mxu1 }
 0xef2   :  { %v516_v11 = vpop.f32.mrb[10].mxu1 }
 0xef3   :  { %v774_v12 = vmul.f32 -1.442695, %v519_v9  ;;  %v866_v13 = vpop.f32.mrb[11].mxu1 }
 0xef5   :  { %930 = vpow2.f32 %v774_v12 }
 0xef6   :  { %932 = vtanh.f32 %v519_v9 }
 0xeff   :  { %v931_v1 = vpop.eup %930 }
 0xf00   :  { %v523_v14 = vadd.f32 1.0, %v931_v1  ;;  %v933_v15 = vpop.eup %932 }
 0xf02   :  { %934 = vrcp.f32 %v523_v14 }
 0xf0c   :  { %v935_v0 = vpop.eup %934 }
 0xf0d   :  { %v527_v2 = vsel %vm1036_vm4, %v933_v15, %v935_v0 }
 0xf0e   :  { %530 = vrot.lane.b32.xlu1 %v527_v2, %s956_s3  ;;  %v528_v20 = vmul.f32 %v527_v2, %v455_v61 }
 0xf80   :  { %v531_v16 = vpop.permute.xlu1 %530 }
 0xf81   :  { %v533_v18 = vmul.f32 %v531_v16, %v527_v2 }
 0xf83   :  { %535 = vrot.lane.b32.xlu0 %v533_v18, %s957_s29 }
 0xff5   :  { %v536_v21 = vpop.permute.xlu0 %535 }
 0xff6   :  { %v538_v22 = vadd.f32 %v536_v21, %v528_v20 }
 0xff8   :  { %936 = vtanh.f32 %v538_v22 }
0x1002   :  { %v937_v23 = vpop.eup %936 }
0x1003   :  { %541 = vrot.lane.b32.xlu1 %v937_v23, %s956_s3 }
0x1075   :  { %v542_v24 = vpop.permute.xlu1 %541 }
0x1076   :  { %v544_v25 = vmul.f32 %v542_v24, %v527_v2 }
0x1078   :  { %v1133_v26 = vpack.c.bf16 %v544_v25, %v544_v25 }
0x107a   :  { %557 = vrot.lane.b32.xlu0 %v1133_v26, %s957_s29 }
0x10ec   :  { %v558_v27 = vpop.permute.xlu0 %557 }
0x10ed   :  { %872 = vmatmul.mubr.msk.bf16.vlgmr.msra.gmra.mrb[12].mxu0 %vm26_vm1, %v558_v27 }
0x11c0   :  { %v596_v29 = vpop.f32.mrb[12].mxu0 }
0x11c1   :  { %v602_v30 = vadd.f32 %v596_v29, %v556_v28  ;;  %v873_v31 = vpop.f32.mrb[13].mxu0 }
0x11c2   :  { %v599_v32 = vpop.f32.mrb[14].mxu0 }
0x11c3   :  { %v779_v34 = vmul.f32 -1.442695, %v602_v30  ;;  %v874_v35 = vpop.f32.mrb[15].mxu0 }
0x11c5   :  { %938 = vpow2.f32 %v779_v34 }
0x11c6   :  { %940 = vtanh.f32 %v602_v30 }
0x11cf   :  { %v939_v36 = vpop.eup %938 }
0x11d0   :  { %v606_v37 = vadd.f32 1.0, %v939_v36  ;;  %v941_v38 = vpop.eup %940 }
0x11d2   :  { %942 = vrcp.f32 %v606_v37 }
0x11dc   :  { %v943_v39 = vpop.eup %942 }
0x11dd   :  { %v610_v40 = vsel %vm1036_vm4, %v941_v38, %v943_v39 }
0x11de   :  { %613 = vrot.lane.b32.xlu1 %v610_v40, %s956_s3  ;;  %v611_v44 = vmul.f32 %v610_v40, %v538_v22 }
0x1250   :  { %v614_v41 = vpop.permute.xlu1 %613 }
0x1251   :  { %v616_v43 = vmul.f32 %v614_v41, %v610_v40 }
0x1253   :  { %618 = vrot.lane.b32.xlu0 %v616_v43, %s957_s29 }
0x12c5   :  { %v619_v45 = vpop.permute.xlu0 %618 }
0x12c6   :  { %v621_v46 = vadd.f32 %v619_v45, %v611_v44 }
0x12c8   :  { %944 = vtanh.f32 %v621_v46 }
0x12d2   :  { %v945_v47 = vpop.eup %944 }
0x12d3   :  { %624 = vrot.lane.b32.xlu1 %v945_v47, %s956_s3 }
0x1345   :  { %v625_v48 = vpop.permute.xlu1 %624 }
0x1346   :  { %v627_v49 = vmul.f32 %v625_v48, %v610_v40 }
0x1348   :  { %v628_v50 = vpack.c.bf16 %v627_v49, %v627_v49 }
0x134a   :  { %640 = vrot.lane.b32.xlu0 %v628_v50, %s957_s29 }
0x13bc   :  { %v641_v51 = vpop.permute.xlu0 %640 }
0x13bd   :  { %880 = vmatmul.mubr.msk.bf16.vlgmr.msra.gmra.mrb[12].mxu1 %vm26_vm1, %v641_v51 }
0x1490   :  { %v679_v54 = vpop.f32.mrb[12].mxu1 }
0x1491   :  { %v685_v55 = vadd.f32 %v679_v54, %v639_v53  ;;  %v881_v57 = vpop.f32.mrb[13].mxu1 }
0x1492   :  { %v682_v58 = vpop.f32.mrb[14].mxu1 }
0x1493   :  { %v784_v59 = vmul.f32 -1.442695, %v685_v55  ;;  %v882_v60 = vpop.f32.mrb[15].mxu1 }
0x1495   :  { %946 = vpow2.f32 %v784_v59 }
0x1496   :  { %948 = vtanh.f32 %v685_v55 }
0x149f   :  { %v947_v61 = vpop.eup %946 }
0x14a0   :  { %v689_v62 = vadd.f32 1.0, %v947_v61  ;;  %v949_v63 = vpop.eup %948 }
0x14a2   :  { %950 = vrcp.f32 %v689_v62 }
0x14ac   :  { %v951_v3 = vpop.eup %950 }
0x14ad   :  { %v693_v5 = vsel %vm1036_vm4, %v949_v63, %v951_v3 }
0x14ae   :  { %696 = vrot.lane.b32.xlu1 %v693_v5, %s956_s3  ;;  %v694_v8 = vmul.f32 %v693_v5, %v621_v46 }
0x1520   :  { %v697_v6 = vpop.permute.xlu1 %696 }
0x1521   :  { %v699_v7 = vmul.f32 %v697_v6, %v693_v5 }
0x1523   :  { %701 = vrot.lane.b32.xlu0 %v699_v7, %s957_s29 }
0x1527   :  { %134 = vrot.lane.b32.xlu0 %v1046_v33, %s957_s29 }
0x152b   :  { %300 = vrot.lane.b32.xlu0 %v1081_v17, %s957_s29 }
0x152f   :  { %466 = vrot.lane.b32.xlu0 %v1115_v4, %s957_s29 }
0x1533   :  { %632 = vrot.lane.b32.xlu0 %v628_v50, %s957_s29 }
0x1595   :  { %v702_v19 = vpop.permute.xlu0 %701 }
0x1596   :  { %v704_v9 = vadd.f32 %v702_v19, %v694_v8 }
0x1598   :  { %952 = vtanh.f32 %v704_v9 }
0x1599   :  { %v135_v10 = vpop.permute.xlu0 %134 }
0x159a   :  { %138 = vst.msk [vmem:[%s1214_s4] sm:$0xf] %vm137_vm5, %v135_v10 }
0x159d   :  { %v301_v33 = vpop.permute.xlu0 %300 }
0x159e   :  { %761 = vst.msk [vmem:[%s1214_s4 + $0x8] sm:$0xf] %vm137_vm5, %v301_v33 }
0x15a1   :  { %v467_v17 = vpop.permute.xlu0 %466 }
0x15a2   :  { %v953_v4 = vpop.eup %952  ;;  %771 = vst.msk [vmem:[%s1214_s4 + $0x10] sm:$0xf] %vm137_vm5, %v467_v17 }
0x15a3   :  { %707 = vrot.lane.b32.xlu1 %v953_v4, %s956_s3 }
0x15a5   :  { %v633_v11 = vpop.permute.xlu0 %632 }
0x15a6   :  { %781 = vst.msk [vmem:[%s1214_s4 + $0x18] sm:$0xf] %vm137_vm5, %v633_v11 }
0x15a7   :  { %217 = vrot.lane.b32.xlu1 %v1065_v56, %s957_s29 }
0x15ab   :  { %383 = vrot.lane.b32.xlu1 %v1100_v42, %s957_s29 }
0x15af   :  { %549 = vrot.lane.b32.xlu1 %v1133_v26, %s957_s29 }
0x1615   :  { %v708_v12 = vpop.permute.xlu1 %707 }
0x1616   :  { %v710_v13 = vmul.f32 %v708_v12, %v693_v5 }
0x1618   :  { %v794_v1 = vpack.c.bf16 %v710_v13, %v710_v13  ;;  %721 = vrot.lane.b32.xlu0 %v710_v13, %s957_s29 }
0x1619   :  { %v218_v14 = vpop.permute.xlu1 %217 }
0x161a   :  { %756 = vst.msk [vmem:[%s1214_s4 + $0x4] sm:$0xf] %vm137_vm5, %v218_v14  ;;  %715 = vrot.lane.b32.xlu1 %v794_v1, %s957_s29 }
0x161d   :  { %v384_v56 = vpop.permute.xlu1 %383 }
0x161e   :  { %766 = vst.msk [vmem:[%s1214_s4 + $0xc] sm:$0xf] %vm137_vm5, %v384_v56  ;;  %726 = vrot.lane.b32.xlu1 %v704_v9, %s958_s25 }
0x1621   :  { %v550_v42 = vpop.permute.xlu1 %549 }
0x1622   :  { %776 = vst.msk [vmem:[%s1214_s4 + $0x14] sm:$0xf] %vm137_vm5, %v550_v42 }
0x168a   :  { %v722_v15 = vpop.permute.xlu0 %721 }
0x168b   :  { %724 = vst.msk [vmem:[#allocation2] sm:$0xff] %vm26_vm1, %v722_v15  ;;  %733 = vst.msk [vmem:[%s1215_s5] sm:$0xff] %vm26_vm1, %v722_v15 }
0x168c   :  { %v716_v0 = vpop.permute.xlu1 %715 }
0x168d   :  { %786 = vst.msk [vmem:[%s1214_s4 + $0x1c] sm:$0xf] %vm137_vm5, %v716_v0 }
0x1690   :  { %v727_v2 = vpop.permute.xlu1 %726 }
0x1691   :  { %729 = vst.msk [vmem:[#allocation3] sm:$0xff] %vm26_vm1, %v727_v2  ;;  %734 = vst.msk [vmem:[%s1216_s6] sm:$0xff] %vm26_vm1, %v727_v2 }

// kernel: lstm_model_forward.7
= control target key start
LH: loop header
LB: loop body
LE: loop exit
PB: predicated region body
PF: predicated region fallthrough
CT: control target
= control target key end

     0   :  { %v1118_v0 = vmov 0.0   ;;  %vm1119_vm0 = vmmov 0   ;;  %vm32_vm1 = vcmask 261120   ;;  %v109_v16 = vlaneseq  ;;  %s1121_s13 = smov 32   ;;  %s1410_s1 = inlined_call_operand.vmem [shape: bf16[32,128], index: 1, kind: input, shape index: {}]   ;;  %s1411_s2 = inlined_call_operand.vmem [shape: f32[8,32], index: 2, kind: input, shape index: {}]   ;;  %s1412_s3 = inlined_call_operand.vmem [shape: f32[8,32], index: 3, kind: input, shape index: {}]   ;;  %s1413_s0 = inlined_call_operand.vmem [shape: bf16[8,8,128], index: 0, kind: input, shape index: {}]   ;;  %s1414_s4 = inlined_call_operand.vmem [shape: bf16[32,4], index: 4, kind: input, shape index: {}]   ;;  %s1415_s8 = inlined_call_operand.vmem [shape: f32[8,32], index: 8, kind: output, shape index: {2}]   ;;  %s1416_s7 = inlined_call_operand.vmem [shape: f32[8,32], index: 7, kind: output, shape index: {1}]   ;;  %s1417_s5 = inlined_call_operand.vmem [shape: f32[1,4], index: 5, kind: input, shape index: {}]   ;;  %s1418_s6 = inlined_call_operand.vmem [shape: f32[8,8,4], index: 6, kind: output, shape index: {0}]  }
   0x1   :  { %937 = vmatprep.subr.bf16.mxu1 %v1118_v0  ;;  %v1172_v1 = vld [vmem:[%s1410_s1] sm:$0xff]   ;;  %941 = vmatprep.mubr.msk.bf16.mxu1 %vm1119_vm0, %v1118_v0  ;;  %v1183_v2 = vld [vmem:[%s1410_s1 + $0x8] sm:$0xff]   ;;  %vm849_vm5 = vcmask 31744  }
   0x2   :  { %953 = vmatprep.subr.bf16.mxu0 %v1118_v0  ;;  %957 = vmatprep.mubr.msk.bf16.mxu0 %vm1119_vm0, %v1118_v0  ;;  %v31_v3 = vld [vmem:[%s1411_s2] sm:$0xff]  ;;  %v110_v18 = vand.u32 127, %v109_v16 }
   0x3   :  { %938 = vmatpush3.bf16.msra.mxu1 %v1172_v1  ;;  %954 = vmatpush3.bf16.msra.mxu0 %v1172_v1  ;;  %33 = vst.msk [vmem:[#allocation2] sm:$0xff] %vm32_vm1, %v31_v3  ;;  %v34_v6 = vld [vmem:[%s1412_s3] sm:$0xff]  ;;  %s1120_s3 = smov 64  }
   0x4   :  { %939 = vmatprep.subr.bf16.mxu1 %v1118_v0  ;;  %955 = vmatprep.subr.bf16.mxu0 %v1118_v0  ;;  %35 = vst.msk [vmem:[#allocation3] sm:$0xff] %vm32_vm1, %v34_v6  ;;  %v42_v7 = vld [vmem:[%s1413_s0] sm:$0xf]  ;;  %vm111_vm2 = vcmp.ge.s32.totalorder %v110_v18, 64  ;;  %vm112_vm3 = vcmp.lt.s32.totalorder %v110_v18, 96  ;;  %v879_v35 = vld [vmem:[%s1413_s0 + $0x4] sm:$0xff]  }
   0x5   :  { %v43_v8 = vunpack.c.l.bf16 %v42_v7  ;;  %vm1210_vm4 = vmand %vm111_vm2, %vm112_vm3  ;;  %v143_v36 = vunpack.c.l.bf16 %v879_v35  ;;  %v225_v58 = vunpack.c.h.bf16 %v879_v35 }
   0x7   :  { %940 = vmatpush3.bf16.msra.mxu1 %v1183_v2  ;;  %956 = vmatpush3.bf16.msra.mxu0 %v1183_v2 }
   0x8   :  { %945 = vmatprep.subr.bf16.mxu1 %v1118_v0  ;;  %969 = vmatprep.subr.bf16.mxu0 %v1118_v0 }
   0xa   :  { %v40_v4 = vld [vmem:[#allocation2] sm:$0xff] }
   0xb   :  { %v44_v5 = vpack.c.bf16 %v40_v4, %v40_v4  ;;  %v41_v23 = vld [vmem:[#allocation3] sm:$0xff] }
   0xd   :  { %942 = vmatmul.mubr.msk.bf16.vlgmr.msra.gmra.mrb[0].mxu1 %vm32_vm1, %v44_v5 }
   0xe   :  { %946 = vmatpush3.bf16.msra.mxu1 %v1172_v1  ;;  %949 = vmatprep.mubr.msk.bf16.mxu1 %vm1119_vm0, %v1118_v0 }
   0xf   :  { %947 = vmatprep.subr.bf16.mxu1 %v1118_v0 }
  0x12   :  { %948 = vmatpush3.bf16.msra.mxu1 %v1183_v2 }
  0x13   :  { %961 = vmatprep.subr.bf16.mxu1 %v1118_v0 }
  0xe0   :  { %v95_v9 = vpop.f32.mrb[0].mxu1 }
  0xe1   :  { %v101_v10 = vadd.f32 %v95_v9, %v43_v8  ;;  %v943_v11 = vpop.f32.mrb[1].mxu1 }
  0xe2   :  { %v98_v12 = vpop.f32.mrb[2].mxu1 }
  0xe3   :  { %v878_v13 = vmul.f32 -1.442695, %v101_v10  ;;  %v944_v14 = vpop.f32.mrb[3].mxu1 }
  0xe5   :  { %1022 = vpow2.f32 %v878_v13 }
  0xe6   :  { %1024 = vtanh.f32 %v101_v10 }
  0xef   :  { %v1023_v15 = vpop.eup %1022 }
  0xf0   :  { %v105_v17 = vadd.f32 1.0, %v1023_v15  ;;  %v1025_v20 = vpop.eup %1024 }
  0xf2   :  { %1026 = vrcp.f32 %v105_v17 }
  0xfc   :  { %v1027_v21 = vpop.eup %1026 }
  0xfd   :  { %v114_v22 = vsel %vm1210_vm4, %v1025_v20, %v1027_v21  ;;  %v885_v20 = vld [vmem:[%s1413_s0 + $0xc] sm:$0xff]  }
  0xfe   :  { %121 = vrot.lane.b32.xlu0 %v114_v22, %s1120_s3  ;;  %v307_v21 = vunpack.c.l.bf16 %v885_v20 }
 0x102   :  { %116 = vrot.lane.b32.xlu0 %v41_v23, %s1121_s13 }
 0x170   :  { %v122_v24 = vpop.permute.xlu0 %121 }
 0x171   :  { %v124_v25 = vmul.f32 %v122_v24, %v114_v22 }
 0x173   :  { %126 = vrot.lane.b32.xlu1 %v124_v25, %s1121_s13 }
 0x174   :  { %v117_v26 = vpop.permute.xlu0 %116 }
 0x175   :  { %v119_v27 = vmul.f32 %v117_v26, %v114_v22 }
 0x1e5   :  { %v127_v28 = vpop.permute.xlu1 %126 }
 0x1e6   :  { %v129_v29 = vadd.f32 %v127_v28, %v119_v27 }
 0x1e8   :  { %1028 = vtanh.f32 %v129_v29 }
 0x1f2   :  { %v1029_v30 = vpop.eup %1028 }
 0x1f3   :  { %132 = vrot.lane.b32.xlu1 %v1029_v30, %s1120_s3 }
 0x265   :  { %v133_v31 = vpop.permute.xlu1 %132 }
 0x266   :  { %v1220_v32 = vmul.f32 %v133_v31, %v114_v22 }
 0x268   :  { %v144_v33 = vpack.c.bf16 %v1220_v32, %v1220_v32 }
 0x26a   :  { %146 = vrot.lane.b32.xlu0 %v144_v33, %s1121_s13 }
 0x2dc   :  { %v147_v34 = vpop.permute.xlu0 %146 }
 0x2dd   :  { %950 = vmatmul.mubr.msk.bf16.vlgmr.msra.gmra.mrb[4].mxu1 %vm32_vm1, %v147_v34 }
 0x2de   :  { %962 = vmatpush3.bf16.msra.mxu1 %v1172_v1  ;;  %965 = vmatprep.mubr.msk.bf16.mxu1 %vm1119_vm0, %v1118_v0 }
 0x2df   :  { %963 = vmatprep.subr.bf16.mxu1 %v1118_v0 }
 0x2e2   :  { %964 = vmatpush3.bf16.msra.mxu1 %v1183_v2 }
 0x2e3   :  { %977 = vmatprep.subr.bf16.mxu1 %v1118_v0 }
 0x3b0   :  { %v185_v37 = vpop.f32.mrb[4].mxu1 }
 0x3b1   :  { %v191_v38 = vadd.f32 %v185_v37, %v143_v36  ;;  %v951_v39 = vpop.f32.mrb[5].mxu1 }
 0x3b2   :  { %v188_v40 = vpop.f32.mrb[6].mxu1 }
 0x3b3   :  { %v881_v41 = vmul.f32 -1.442695, %v191_v38  ;;  %v952_v42 = vpop.f32.mrb[7].mxu1 }
 0x3b5   :  { %1030 = vpow2.f32 %v881_v41 }
 0x3b6   :  { %1032 = vtanh.f32 %v191_v38 }
 0x3bf   :  { %v1031_v43 = vpop.eup %1030 }
 0x3c0   :  { %v195_v44 = vadd.f32 1.0, %v1031_v43  ;;  %v1033_v45 = vpop.eup %1032 }
 0x3c2   :  { %1034 = vrcp.f32 %v195_v44  ;;  %v389_v44 = vunpack.c.h.bf16 %v885_v20 }
 0x3cc   :  { %v1035_v46 = vpop.eup %1034 }
 0x3cd   :  { %v199_v47 = vsel %vm1210_vm4, %v1033_v45, %v1035_v46 }
 0x3ce   :  { %202 = vrot.lane.b32.xlu1 %v199_v47, %s1120_s3  ;;  %v200_v50 = vmul.f32 %v199_v47, %v129_v29 }
 0x440   :  { %v203_v48 = vpop.permute.xlu1 %202 }
 0x441   :  { %v205_v49 = vmul.f32 %v203_v48, %v199_v47 }
 0x443   :  { %207 = vrot.lane.b32.xlu0 %v205_v49, %s1121_s13 }
 0x4b5   :  { %v208_v51 = vpop.permute.xlu0 %207 }
 0x4b6   :  { %v210_v52 = vadd.f32 %v208_v51, %v200_v50 }
 0x4b8   :  { %1036 = vtanh.f32 %v210_v52 }
 0x4c2   :  { %v1037_v53 = vpop.eup %1036 }
 0x4c3   :  { %213 = vrot.lane.b32.xlu1 %v1037_v53, %s1120_s3 }
 0x535   :  { %v214_v54 = vpop.permute.xlu1 %213 }
 0x536   :  { %v1240_v55 = vmul.f32 %v214_v54, %v199_v47 }
 0x538   :  { %v226_v56 = vpack.c.bf16 %v1240_v55, %v1240_v55 }
 0x53a   :  { %228 = vrot.lane.b32.xlu0 %v226_v56, %s1121_s13 }
 0x5ac   :  { %v229_v57 = vpop.permute.xlu0 %228 }
 0x5ad   :  { %958 = vmatmul.mubr.msk.bf16.vlgmr.msra.gmra.mrb[0].mxu0 %vm32_vm1, %v229_v57 }
 0x5ae   :  { %970 = vmatpush3.bf16.msra.mxu0 %v1172_v1  ;;  %973 = vmatprep.mubr.msk.bf16.mxu0 %vm1119_vm0, %v1118_v0 }
 0x5af   :  { %971 = vmatprep.subr.bf16.mxu0 %v1118_v0 }
 0x5b2   :  { %972 = vmatpush3.bf16.msra.mxu0 %v1183_v2 }
 0x5b3   :  { %985 = vmatprep.subr.bf16.mxu0 %v1118_v0 }
 0x680   :  { %v267_v59 = vpop.f32.mrb[0].mxu0 }
 0x681   :  { %v273_v60 = vadd.f32 %v267_v59, %v225_v58  ;;  %v959_v61 = vpop.f32.mrb[1].mxu0 }
 0x682   :  { %v270_v62 = vpop.f32.mrb[2].mxu0 }
 0x683   :  { %v884_v63 = vmul.f32 -1.442695, %v273_v60  ;;  %v960_v3 = vpop.f32.mrb[3].mxu0 }
 0x685   :  { %1038 = vpow2.f32 %v884_v63 }
 0x686   :  { %1040 = vtanh.f32 %v273_v60 }
 0x68f   :  { %v1039_v4 = vpop.eup %1038 }
 0x690   :  { %v277_v5 = vadd.f32 1.0, %v1039_v4  ;;  %v1041_v6 = vpop.eup %1040 }
 0x692   :  { %1042 = vrcp.f32 %v277_v5 }
 0x69c   :  { %v1043_v7 = vpop.eup %1042 }
 0x69d   :  { %v281_v8 = vsel %vm1210_vm4, %v1041_v6, %v1043_v7  ;;  %v891_v6 = vld [vmem:[%s1413_s0 + $0x14] sm:$0xff]  }
 0x69e   :  { %284 = vrot.lane.b32.xlu1 %v281_v8, %s1120_s3  ;;  %v282_v11 = vmul.f32 %v281_v8, %v210_v52  ;;  %v471_v7 = vunpack.c.l.bf16 %v891_v6 }
 0x710   :  { %v285_v9 = vpop.permute.xlu1 %284 }
 0x711   :  { %v287_v10 = vmul.f32 %v285_v9, %v281_v8 }
 0x713   :  { %289 = vrot.lane.b32.xlu0 %v287_v10, %s1121_s13 }
 0x785   :  { %v290_v12 = vpop.permute.xlu0 %289 }
 0x786   :  { %v292_v13 = vadd.f32 %v290_v12, %v282_v11 }
 0x788   :  { %1044 = vtanh.f32 %v292_v13 }
 0x792   :  { %v1045_v14 = vpop.eup %1044 }
 0x793   :  { %295 = vrot.lane.b32.xlu1 %v1045_v14, %s1120_s3 }
 0x805   :  { %v296_v15 = vpop.permute.xlu1 %295 }
 0x806   :  { %v1257_v16 = vmul.f32 %v296_v15, %v281_v8 }
 0x808   :  { %v308_v17 = vpack.c.bf16 %v1257_v16, %v1257_v16 }
 0x80a   :  { %310 = vrot.lane.b32.xlu0 %v308_v17, %s1121_s13 }
 0x87c   :  { %v311_v18 = vpop.permute.xlu0 %310 }
 0x87d   :  { %966 = vmatmul.mubr.msk.bf16.vlgmr.msra.gmra.mrb[8].mxu1 %vm32_vm1, %v311_v18 }
 0x87e   :  { %978 = vmatpush3.bf16.msra.mxu1 %v1172_v1  ;;  %981 = vmatprep.mubr.msk.bf16.mxu1 %vm1119_vm0, %v1118_v0 }
 0x87f   :  { %979 = vmatprep.subr.bf16.mxu1 %v1118_v0 }
 0x882   :  { %980 = vmatpush3.bf16.msra.mxu1 %v1183_v2 }
 0x883   :  { %993 = vmatprep.subr.bf16.mxu1 %v1118_v0 }
 0x950   :  { %v349_v22 = vpop.f32.mrb[8].mxu1 }
 0x951   :  { %v355_v23 = vadd.f32 %v349_v22, %v307_v21  ;;  %v967_v24 = vpop.f32.mrb[9].mxu1 }
 0x952   :  { %v352_v25 = vpop.f32.mrb[10].mxu1 }
 0x953   :  { %v887_v26 = vmul.f32 -1.442695, %v355_v23  ;;  %v968_v27 = vpop.f32.mrb[11].mxu1 }
 0x955   :  { %1046 = vpow2.f32 %v887_v26 }
 0x956   :  { %1048 = vtanh.f32 %v355_v23 }
 0x95f   :  { %v1047_v28 = vpop.eup %1046 }
 0x960   :  { %v359_v29 = vadd.f32 1.0, %v1047_v28  ;;  %v1049_v30 = vpop.eup %1048  ;;  %v553_v28 = vunpack.c.h.bf16 %v891_v6 }
 0x962   :  { %1050 = vrcp.f32 %v359_v29 }
 0x96c   :  { %v1051_v31 = vpop.eup %1050 }
 0x96d   :  { %v363_v33 = vsel %vm1210_vm4, %v1049_v30, %v1051_v31 }
 0x96e   :  { %366 = vrot.lane.b32.xlu1 %v363_v33, %s1120_s3  ;;  %v364_v36 = vmul.f32 %v363_v33, %v292_v13 }
 0x9e0   :  { %v367_v34 = vpop.permute.xlu1 %366 }
 0x9e1   :  { %v369_v35 = vmul.f32 %v367_v34, %v363_v33 }
 0x9e3   :  { %371 = vrot.lane.b32.xlu0 %v369_v35, %s1121_s13 }
 0xa55   :  { %v372_v37 = vpop.permute.xlu0 %371 }
 0xa56   :  { %v374_v38 = vadd.f32 %v372_v37, %v364_v36 }
 0xa58   :  { %1052 = vtanh.f32 %v374_v38 }
 0xa62   :  { %v1053_v39 = vpop.eup %1052 }
 0xa63   :  { %377 = vrot.lane.b32.xlu1 %v1053_v39, %s1120_s3 }
 0xad5   :  { %v378_v40 = vpop.permute.xlu1 %377 }
 0xad6   :  { %v1277_v41 = vmul.f32 %v378_v40, %v363_v33 }
 0xad8   :  { %v390_v42 = vpack.c.bf16 %v1277_v41, %v1277_v41 }
 0xada   :  { %392 = vrot.lane.b32.xlu0 %v390_v42, %s1121_s13 }
 0xb4c   :  { %v393_v43 = vpop.permute.xlu0 %392 }
 0xb4d   :  { %974 = vmatmul.mubr.msk.bf16.vlgmr.msra.gmra.mrb[4].mxu0 %vm32_vm1, %v393_v43 }
 0xb4e   :  { %986 = vmatpush3.bf16.msra.mxu0 %v1172_v1  ;;  %989 = vmatprep.mubr.msk.bf16.mxu0 %vm1119_vm0, %v1118_v0 }
 0xb4f   :  { %987 = vmatprep.subr.bf16.mxu0 %v1118_v0 }
 0xb52   :  { %988 = vmatpush3.bf16.msra.mxu0 %v1183_v2 }
 0xc20   :  { %v431_v45 = vpop.f32.mrb[4].mxu0 }
 0xc21   :  { %v437_v46 = vadd.f32 %v431_v45, %v389_v44  ;;  %v975_v47 = vpop.f32.mrb[5].mxu0 }
 0xc22   :  { %v434_v48 = vpop.f32.mrb[6].mxu0 }
 0xc23   :  { %v890_v49 = vmul.f32 -1.442695, %v437_v46  ;;  %v976_v50 = vpop.f32.mrb[7].mxu0 }
 0xc25   :  { %1054 = vpow2.f32 %v890_v49 }
 0xc26   :  { %1056 = vtanh.f32 %v437_v46 }
 0xc2f   :  { %v1055_v51 = vpop.eup %1054 }
 0xc30   :  { %v441_v52 = vadd.f32 1.0, %v1055_v51  ;;  %v1057_v53 = vpop.eup %1056 }
 0xc32   :  { %1058 = vrcp.f32 %v441_v52  ;;  %v897_v52 = vld [vmem:[%s1413_s0 + $0x1c] sm:$0xf]  ;;  %s1122_s0 = smov 96  }
 0xc3c   :  { %v1059_v54 = vpop.eup %1058 }
 0xc3d   :  { %v445_v56 = vsel %vm1210_vm4, %v1057_v53, %v1059_v54  ;;  %v635_v53 = vunpack.c.l.bf16 %v897_v52 }
 0xc3e   :  { %448 = vrot.lane.b32.xlu1 %v445_v56, %s1120_s3  ;;  %v446_v59 = vmul.f32 %v445_v56, %v374_v38 }
 0xcb0   :  { %v449_v57 = vpop.permute.xlu1 %448 }
 0xcb1   :  { %v451_v58 = vmul.f32 %v449_v57, %v445_v56 }
 0xcb3   :  { %453 = vrot.lane.b32.xlu0 %v451_v58, %s1121_s13 }
 0xd25   :  { %v454_v60 = vpop.permute.xlu0 %453 }
 0xd26   :  { %v456_v61 = vadd.f32 %v454_v60, %v446_v59 }
 0xd28   :  { %1060 = vtanh.f32 %v456_v61 }
 0xd32   :  { %v1061_v62 = vpop.eup %1060 }
 0xd33   :  { %459 = vrot.lane.b32.xlu1 %v1061_v62, %s1120_s3 }
 0xda5   :  { %v460_v63 = vpop.permute.xlu1 %459 }
 0xda6   :  { %v1293_v3 = vmul.f32 %v460_v63, %v445_v56 }
 0xda8   :  { %v472_v4 = vpack.c.bf16 %v1293_v3, %v1293_v3 }
 0xdaa   :  { %474 = vrot.lane.b32.xlu0 %v472_v4, %s1121_s13 }
 0xe1c   :  { %v475_v5 = vpop.permute.xlu0 %474 }
 0xe1d   :  { %982 = vmatmul.mubr.msk.bf16.vlgmr.msra.gmra.mrb[12].mxu1 %vm32_vm1, %v475_v5 }
 0xe1e   :  { %994 = vmatpush3.bf16.msra.mxu1 %v1172_v1  ;;  %997 = vmatprep.mubr.msk.bf16.mxu1 %vm1119_vm0, %v1118_v0 }
 0xe1f   :  { %995 = vmatprep.subr.bf16.mxu1 %v1118_v0 }
 0xe22   :  { %996 = vmatpush3.bf16.msra.mxu1 %v1183_v2 }
 0xef0   :  { %v513_v8 = vpop.f32.mrb[12].mxu1 }
 0xef1   :  { %v519_v9 = vadd.f32 %v513_v8, %v471_v7  ;;  %v983_v10 = vpop.f32.mrb[13].mxu1 }
 0xef2   :  { %v516_v11 = vpop.f32.mrb[14].mxu1 }
 0xef3   :  { %v893_v12 = vmul.f32 -1.442695, %v519_v9  ;;  %v984_v13 = vpop.f32.mrb[15].mxu1 }
 0xef5   :  { %1062 = vpow2.f32 %v893_v12 }
 0xef6   :  { %1064 = vtanh.f32 %v519_v9 }
 0xeff   :  { %v1063_v1 = vpop.eup %1062 }
 0xf00   :  { %v523_v14 = vadd.f32 1.0, %v1063_v1  ;;  %v1065_v15 = vpop.eup %1064 }
 0xf02   :  { %1066 = vrcp.f32 %v523_v14 }
 0xf0c   :  { %v1067_v0 = vpop.eup %1066 }
 0xf0d   :  { %v527_v2 = vsel %vm1210_vm4, %v1065_v15, %v1067_v0 }
 0xf0e   :  { %530 = vrot.lane.b32.xlu1 %v527_v2, %s1120_s3  ;;  %v528_v20 = vmul.f32 %v527_v2, %v456_v61 }
 0xf80   :  { %v531_v17 = vpop.permute.xlu1 %530 }
 0xf81   :  { %v533_v18 = vmul.f32 %v531_v17, %v527_v2 }
 0xf83   :  { %535 = vrot.lane.b32.xlu0 %v533_v18, %s1121_s13 }
 0xff5   :  { %v536_v21 = vpop.permute.xlu0 %535 }
 0xff6   :  { %v538_v22 = vadd.f32 %v536_v21, %v528_v20 }
 0xff8   :  { %1068 = vtanh.f32 %v538_v22 }
0x1002   :  { %v1069_v23 = vpop.eup %1068 }
0x1003   :  { %541 = vrot.lane.b32.xlu1 %v1069_v23, %s1120_s3 }
0x1075   :  { %v542_v24 = vpop.permute.xlu1 %541 }
0x1076   :  { %v1312_v25 = vmul.f32 %v542_v24, %v527_v2 }
0x1078   :  { %v554_v26 = vpack.c.bf16 %v1312_v25, %v1312_v25 }
0x107a   :  { %556 = vrot.lane.b32.xlu0 %v554_v26, %s1121_s13 }
0x10ec   :  { %v557_v27 = vpop.permute.xlu0 %556 }
0x10ed   :  { %990 = vmatmul.mubr.msk.bf16.vlgmr.msra.gmra.mrb[8].mxu0 %vm32_vm1, %v557_v27 }
0x11c0   :  { %v595_v29 = vpop.f32.mrb[8].mxu0 }
0x11c1   :  { %v601_v30 = vadd.f32 %v595_v29, %v553_v28  ;;  %v991_v31 = vpop.f32.mrb[9].mxu0 }
0x11c2   :  { %v598_v33 = vpop.f32.mrb[10].mxu0 }
0x11c3   :  { %v896_v34 = vmul.f32 -1.442695, %v601_v30  ;;  %v992_v35 = vpop.f32.mrb[11].mxu0 }
0x11c5   :  { %1070 = vpow2.f32 %v896_v34 }
0x11c6   :  { %1072 = vtanh.f32 %v601_v30 }
0x11cf   :  { %v1071_v36 = vpop.eup %1070 }
0x11d0   :  { %v605_v37 = vadd.f32 1.0, %v1071_v36  ;;  %v1073_v38 = vpop.eup %1072 }
0x11d2   :  { %1074 = vrcp.f32 %v605_v37 }
0x11dc   :  { %v1075_v39 = vpop.eup %1074 }
0x11dd   :  { %v609_v40 = vsel %vm1210_vm4, %v1073_v38, %v1075_v39  ;;  %v900_v39 = vld [vmem:[%s1417_s5] ss:$0 sm:$0xff] }
0x11de   :  { %612 = vrot.lane.b32.xlu1 %v609_v40, %s1120_s3  ;;  %v610_v44 = vmul.f32 %v609_v40, %v538_v22 }
0x1250   :  { %v613_v42 = vpop.permute.xlu1 %612 }
0x1251   :  { %v615_v43 = vmul.f32 %v613_v42, %v609_v40 }
0x1253   :  { %617 = vrot.lane.b32.xlu0 %v615_v43, %s1121_s13 }
0x12c5   :  { %v618_v45 = vpop.permute.xlu0 %617 }
0x12c6   :  { %v620_v46 = vadd.f32 %v618_v45, %v610_v44 }
0x12c8   :  { %1076 = vtanh.f32 %v620_v46 }
0x12d2   :  { %v1077_v47 = vpop.eup %1076 }
0x12d3   :  { %623 = vrot.lane.b32.xlu1 %v1077_v47, %s1120_s3 }
0x1345   :  { %v624_v48 = vpop.permute.xlu1 %623 }
0x1346   :  { %v626_v49 = vmul.f32 %v624_v48, %v609_v40 }
0x1348   :  { %v636_v50 = vpack.c.bf16 %v626_v49, %v626_v49 }
0x134a   :  { %638 = vrot.lane.b32.xlu0 %v636_v50, %s1121_s13 }
0x13bc   :  { %v639_v51 = vpop.permute.xlu0 %638 }
0x13bd   :  { %998 = vmatmul.mubr.msk.bf16.vlgmr.msra.gmra.mrb[16].mxu1 %vm32_vm1, %v639_v51 }
0x1490   :  { %v677_v54 = vpop.f32.mrb[16].mxu1 }
0x1491   :  { %v683_v56 = vadd.f32 %v677_v54, %v635_v53  ;;  %v999_v57 = vpop.f32.mrb[17].mxu1 }
0x1492   :  { %v680_v58 = vpop.f32.mrb[18].mxu1 }
0x1493   :  { %v899_v59 = vmul.f32 -1.442695, %v683_v56  ;;  %v1000_v60 = vpop.f32.mrb[19].mxu1 }
0x1495   :  { %1078 = vpow2.f32 %v899_v59 }
0x1496   :  { %1080 = vtanh.f32 %v683_v56 }
0x149f   :  { %v1079_v61 = vpop.eup %1078 }
0x14a0   :  { %v687_v62 = vadd.f32 1.0, %v1079_v61  ;;  %v1081_v63 = vpop.eup %1080 }
0x14a2   :  { %1082 = vrcp.f32 %v687_v62 }
0x14ac   :  { %v1083_v4 = vpop.eup %1082 }
0x14ad   :  { %v691_v5 = vsel %vm1210_vm4, %v1081_v63, %v1083_v4 }
0x14ae   :  { %694 = vrot.lane.b32.xlu1 %v691_v5, %s1120_s3  ;;  %v692_v8 = vmul.f32 %v691_v5, %v620_v46 }
0x1520   :  { %v695_v6 = vpop.permute.xlu1 %694 }
0x1521   :  { %v697_v7 = vmul.f32 %v695_v6, %v691_v5 }
0x1523   :  { %699 = vrot.lane.b32.xlu0 %v697_v7, %s1121_s13 }
0x1527   :  { %137 = vrot.lane.b32.xlu0 %v1220_v32, %s1121_s13 }
0x152b   :  { %300 = vrot.lane.b32.xlu0 %v1257_v16, %s1121_s13  ;;  %v1020_v16 = vld [vmem:[%s1414_s4] sm:$0xff]  }
0x152c   :  { %1001 = vmatprep.subr.bf16.mxu0 %v1020_v16 }
0x152d   :  { %1002 = vmatpush3.bf16.msra.mxu0 %v1020_v16 }
0x152f   :  { %464 = vrot.lane.b32.xlu0 %v1293_v3, %s1121_s13  ;;  %v1021_v3 = vld [vmem:[%s1414_s4 + $0x8] sm:$0xff]  }
0x1530   :  { %1003 = vmatprep.subr.bf16.mxu0 %v1021_v3 }
0x1531   :  { %1004 = vmatpush3.bf16.msra.mxu0 %v1021_v3 }
0x1533   :  { %628 = vrot.lane.b32.xlu0 %v626_v49, %s1121_s13 }
0x1595   :  { %v700_v19 = vpop.permute.xlu0 %699 }
0x1596   :  { %v702_v9 = vadd.f32 %v700_v19, %v692_v8 }
0x1598   :  { %1084 = vtanh.f32 %v702_v9  ;;  %717 = vrot.lane.b32.xlu0 %v702_v9, %s1122_s0 }
0x1599   :  { %v138_v10 = vpop.permute.xlu0 %137 }
0x159a   :  { %140 = vst.msk [vmem:[#allocation4] sm:$0xff] %vm32_vm1, %v138_v10 }
0x159d   :  { %v301_v11 = vpop.permute.xlu0 %300 }
0x159e   :  { %304 = vst.msk [vmem:[#allocation4 + $0x10] sm:$0xff] %vm32_vm1, %v301_v11 }
0x15a1   :  { %v465_v32 = vpop.permute.xlu0 %464 }
0x15a2   :  { %v1085_v12 = vpop.eup %1084  ;;  %468 = vst.msk [vmem:[#allocation4 + $0x20] sm:$0xff] %vm32_vm1, %v465_v32 }
0x15a3   :  { %705 = vrot.lane.b32.xlu1 %v1085_v12, %s1120_s3 }
0x15a5   :  { %v629_v13 = vpop.permute.xlu0 %628  ;;  %v723_v18 = vld [vmem:[#allocation4 + $0x10] sm:$0xff] }
0x15a6   :  { %632 = vst.msk [vmem:[#allocation4 + $0x30] sm:$0xff] %vm32_vm1, %v629_v13 }
0x15a7   :  { %218 = vrot.lane.b32.xlu1 %v1240_v55, %s1121_s13 }
0x15a9   :  { %v725_v21 = vld [vmem:[#allocation4 + $0x20] sm:$0xff] }
0x15ab   :  { %382 = vrot.lane.b32.xlu1 %v1277_v41, %s1121_s13  ;;  %v721_v41 = vld [vmem:[#allocation4] sm:$0xff] }
0x15ac   :  { %1086 = vtanh.f32 %v721_v41 }
0x15ad   :  { %v727_v34 = vld [vmem:[#allocation4 + $0x30] sm:$0xff] }
0x15af   :  { %546 = vrot.lane.b32.xlu1 %v1312_v25, %s1121_s13 }
0x15b6   :  { %v1087_v23 = vpop.eup %1086 }
0x160a   :  { %v718_v1 = vpop.permute.xlu0 %717 }
0x160b   :  { %720 = vst.msk [vmem:[#allocation3] sm:$0xff] %vm32_vm1, %v718_v1  ;;  %862 = vst.msk [vmem:[%s1415_s8] sm:$0xff] %vm32_vm1, %v718_v1 }
0x1615   :  { %v706_v14 = vpop.permute.xlu1 %705 }
0x1616   :  { %v708_v15 = vmul.f32 %v706_v14, %v691_v5 }
0x1618   :  { %710 = vrot.lane.b32.xlu1 %v708_v15, %s1121_s13 }
0x1619   :  { %v219_v55 = vpop.permute.xlu1 %218 }
0x161a   :  { %222 = vst.msk [vmem:[#allocation4 + $0x8] sm:$0xff] %vm32_vm1, %v219_v55 }
0x161d   :  { %v383_v0 = vpop.permute.xlu1 %382 }
0x161e   :  { %386 = vst.msk [vmem:[#allocation4 + $0x18] sm:$0xff] %vm32_vm1, %v383_v0 }
0x1621   :  { %v547_v2 = vpop.permute.xlu1 %546  ;;  %v722_v17 = vld [vmem:[#allocation4 + $0x8] sm:$0xff] }
0x1622   :  { %550 = vst.msk [vmem:[#allocation4 + $0x28] sm:$0xff] %vm32_vm1, %v547_v2  ;;  %1088 = vtanh.f32 %v722_v17 }
0x1623   :  { %1090 = vtanh.f32 %v723_v18 }
0x1625   :  { %v724_v20 = vld [vmem:[#allocation4 + $0x18] sm:$0xff] }
0x1626   :  { %1092 = vtanh.f32 %v724_v20 }
0x1627   :  { %1094 = vtanh.f32 %v725_v21 }
0x1629   :  { %v726_v22 = vld [vmem:[#allocation4 + $0x28] sm:$0xff] }
0x162a   :  { %1096 = vtanh.f32 %v726_v22 }
0x162b   :  { %1098 = vtanh.f32 %v727_v34 }
0x162c   :  { %v1089_v24 = vpop.eup %1088 }
0x162d   :  { %v737_v25 = vpack.c.bf16 %v1089_v24, %v1087_v23  ;;  %v1091_v26 = vpop.eup %1090 }
0x162f   :  { %1005 = vmatprep.mubr.msk.bf16.mxu0 %vm32_vm1, %v737_v25 }
0x1630   :  { %v1093_v27 = vpop.eup %1092 }
0x1631   :  { %v738_v28 = vpack.c.bf16 %v1093_v27, %v1091_v26  ;;  %v1095_v29 = vpop.eup %1094 }
0x1633   :  { %1006 = vmatmul.mubr.msk.bf16.vlgmr.msra.gmra.mrb[12].mxu0 %vm32_vm1, %v738_v28 }
0x1634   :  { %v1097_v30 = vpop.eup %1096 }
0x1635   :  { %v739_v31 = vpack.c.bf16 %v1097_v30, %v1095_v29  ;;  %v1099_v36 = vpop.eup %1098 }
0x1637   :  { %1009 = vmatprep.mubr.msk.bf16.mxu0 %vm32_vm1, %v739_v31 }
0x168a   :  { %v711_v33 = vpop.permute.xlu1 %710 }
0x168b   :  { %714 = vst.msk [vmem:[#allocation4 + $0x38] sm:$0xff] %vm32_vm1, %v711_v33  ;;  %715 = vst.msk [vmem:[#allocation2] sm:$0xff] %vm32_vm1, %v711_v33 }
0x168c   :  { %861 = vst.msk [vmem:[%s1416_s7] sm:$0xff] %vm32_vm1, %v711_v33 }
0x1692   :  { %v728_v35 = vld [vmem:[#allocation4 + $0x38] sm:$0xff] }
0x1693   :  { %1100 = vtanh.f32 %v728_v35 }
0x169d   :  { %v1101_v37 = vpop.eup %1100 }
0x169e   :  { %v740_v38 = vpack.c.bf16 %v1101_v37, %v1099_v36 }
0x16a0   :  { %1010 = vmatmul.mubr.msk.bf16.gmra.mrb[16].mxu0 %vm32_vm1, %v740_v38 }
0x1706   :  { %v1007_v40 = vpop.f32.mrb[12].mxu0 }
0x1707   :  { %v819_v42 = vadd.f32 %v1007_v40, %v900_v39  ;;  %v810_v43 = vpop.f32.mrb[13].mxu0 }
0x1708   :  { %v811_v44 = vadd.f32 %v900_v39, %v810_v43  ;;  %v1008_v45 = vpop.f32.mrb[14].mxu0 }
0x1709   :  { %1102 = vtanh.f32 %v819_v42  ;;  %v822_v46 = vadd.f32 %v1008_v45, %v900_v39  ;;  %v813_v47 = vpop.f32.mrb[15].mxu0 }
0x170a   :  { %1104 = vtanh.f32 %v811_v44  ;;  %v814_v48 = vadd.f32 %v900_v39, %v813_v47 }
0x170b   :  { %1106 = vtanh.f32 %v822_v46 }
0x170c   :  { %1108 = vtanh.f32 %v814_v48 }
0x1713   :  { %v1103_v49 = vpop.eup %1102 }
0x1714   :  { %v1105_v50 = vpop.eup %1104  ;;  %852 = vst.msk [vmem:[%s1418_s6 + $0x10] sm:$0xff] %vm849_vm5, %v1103_v49 }
0x1715   :  { %v1107_v51 = vpop.eup %1106  ;;  %850 = vst.msk [vmem:[%s1418_s6] sm:$0xff] %vm849_vm5, %v1105_v50 }
0x1716   :  { %v1109_v52 = vpop.eup %1108  ;;  %853 = vst.msk [vmem:[%s1418_s6 + $0x18] sm:$0xff] %vm849_vm5, %v1107_v51 }
0x1717   :  { %851 = vst.msk [vmem:[%s1418_s6 + $0x8] sm:$0xff] %vm849_vm5, %v1109_v52 }
0x1773   :  { %v1011_v53 = vpop.f32.mrb[16].mxu0 }
0x1774   :  { %v835_v54 = vadd.f32 %v1011_v53, %v900_v39  ;;  %v826_v56 = vpop.f32.mrb[17].mxu0 }
0x1775   :  { %v827_v57 = vadd.f32 %v900_v39, %v826_v56  ;;  %v1012_v58 = vpop.f32.mrb[18].mxu0 }
0x1776   :  { %1110 = vtanh.f32 %v835_v54  ;;  %v838_v59 = vadd.f32 %v1012_v58, %v900_v39  ;;  %v829_v60 = vpop.f32.mrb[19].mxu0 }
0x1777   :  { %1112 = vtanh.f32 %v827_v57  ;;  %v830_v61 = vadd.f32 %v900_v39, %v829_v60 }
0x1778   :  { %1114 = vtanh.f32 %v838_v59 }
0x1779   :  { %1116 = vtanh.f32 %v830_v61 }
0x1780   :  { %v1111_v62 = vpop.eup %1110 }
0x1781   :  { %v1113_v63 = vpop.eup %1112  ;;  %856 = vst.msk [vmem:[%s1418_s6 + $0x30] sm:$0xff] %vm849_vm5, %v1111_v62 }
0x1782   :  { %v1115_v4 = vpop.eup %1114  ;;  %854 = vst.msk [vmem:[%s1418_s6 + $0x20] sm:$0xff] %vm849_vm5, %v1113_v63 }
0x1783   :  { %v1117_v5 = vpop.eup %1116  ;;  %857 = vst.msk [vmem:[%s1418_s6 + $0x38] sm:$0xff] %vm849_vm5, %v1115_v4 }
0x1784   :  { %855 = vst.msk [vmem:[%s1418_s6 + $0x28] sm:$0xff] %vm849_vm5, %v1117_v5 }

</bundles_post_ra>
